<compile_context>
chip_gen: v7x
topology: tpu7x:2x2x1
jax: 0.10.0
libtpu: 0.0.40
codegen_flags: <defaults>
</compile_context>

<pallas_src>
import functools

import jax
import jax.numpy as jnp
from jax import lax
from jax.experimental import pallas as pl
from jax.experimental.pallas import tpu as pltpu


def _round_up(v, m):
    return ((v + m - 1) // m) * m


# ---------------------------------------------------------------------------
# Pallas kernel: one (batch, spatial-tile) grid step.
# ---------------------------------------------------------------------------
def conv_bn_act_kernel(x_ref, w_ref, b_ref, o_ref, *,
                       taps, tm, halo, c1, apply_act, per_tap):
    # x_ref: (1, Pf_p, c1)  bf16 zero-padded, row-major flattened image (resident)
    # w_ref: (k*k*c1, c2p)  bf16 BN-folded weight (tap-major, then in-channel)
    # b_ref: (1, c2p)       f32  BN-folded bias
    # o_ref: (1, tm, c2p)   bf16 output tile
    m = pl.program_id(1)
    base = pl.multiple_of(m * tm, 8)                    # tm is a multiple of 8

    if per_tap:
        # Large-c1 path: accumulate k*k per-tap matmuls in f32; no (tm, k*k*c1)
        # patches intermediate, each tap already has K = c1 >= 128 for the MXU.
        acc = None
        for t, s in enumerate(taps):
            tap = x_ref[0, pl.ds(base + s, tm), :]                      # (tm, c1) bf16
            part = jnp.dot(tap, w_ref[t * c1:(t + 1) * c1, :],
                           preferred_element_type=jnp.float32)          # (tm, c2p) f32
            acc = part if acc is None else acc + part
        y = acc
    else:
        # Small-c1 path: one aligned window load, static tap slices, single matmul
        # so K = k*k*c1 (instead of a tiny K = c1) feeds the MXU.
        win = x_ref[0, pl.ds(base, tm + halo), :]                       # (tm+halo, c1)
        pieces = [win[s:s + tm, :] for s in taps]                       # each (tm, c1)
        patches = pieces[0] if len(pieces) == 1 else jnp.concatenate(pieces, axis=1)
        y = jnp.dot(patches, w_ref[...], preferred_element_type=jnp.float32)

    y = y + b_ref[...]                                  # folded BN bias, f32
    if apply_act:
        # SiLU: y * sigmoid(y); exp + approx reciprocal both run on the EUP slot.
        y = y * pl.reciprocal(1.0 + jnp.exp(-y), approx=True)
    o_ref[0] = y.astype(o_ref.dtype)


# ---------------------------------------------------------------------------
# Wrapper: NCHW in / NCHW (bf16) out, BN folding, padding, pallas_call.
# ---------------------------------------------------------------------------
def conv_pallas(x_nchw, conv_weight, bn_gamma, bn_beta, bn_mean, bn_var,
                *, k, s=1, act=True, eps=1e-5, tile_m=512):
    """Conv(c1, c2, k, s=1, p=autopad(k), g=1) + BatchNorm2d (inference) + SiLU."""
    assert s == 1, "TODO(synk): stride > 1 not implemented"
    assert k % 2 == 1, "autopad assumes odd kernel size here"
    B, c1, H, W = x_nchw.shape
    c2 = conv_weight.shape[0]
    assert conv_weight.shape == (c2, c1, k, k), "groups != 1 not supported"

    pad = k // 2
    Wp = _round_up(W + pad, 8)          # sublane-aligned per-row stride (extra cols = 0)
    Pout = H * Wp                       # rows computed per image (pad cols sliced off)
    halo = 2 * pad * Wp + 2 * pad       # largest tap offset

    # ---- spatial tile size (multiple of 8; >=2 tiles when the image allows it) -----
    if Pout > tile_m:
        TM = tile_m
    elif Pout >= 128:
        TM = max(8, ((Pout // 2) // 8) * 8)
    else:
        TM = _round_up(Pout, 8)
    n_tiles = pl.cdiv(Pout, TM)
    Pout_p = n_tiles * TM               # padded output rows (extra rows read zeros)
    Pf_p = Pout_p + halo                # padded, flattened input length

    # ---- fold inference BatchNorm into weight / bias ------------------------------
    scale = bn_gamma / jnp.sqrt(bn_var + eps)                       # (c2,)
    bias = bn_beta - bn_mean * scale                                # (c2,)
    # torch (c2, c1, kh, kw) -> (kh, kw, c1, c2) -> (k*k*c1, c2), scaled per out-channel.
    w = jnp.transpose(conv_weight, (2, 3, 1, 0)).reshape(k * k * c1, c2) * scale[None, :]

    # ---- lane-dense output: pad c2 up to a multiple of 128 ------------------------
    c2p = _round_up(c2, 128)
    if c2p != c2:
        w = jnp.pad(w, ((0, 0), (0, c2p - c2)))
        bias = jnp.pad(bias, (0, c2p - c2))
    w = w.astype(jnp.bfloat16)                                      # half the weight DMA
    bias = bias.reshape(1, c2p).astype(jnp.float32)
    kdim = k * k * c1

    # ---- zero-padded, row-major flattened bf16 activation (B, Pf_p, c1) -----------
    x = jnp.transpose(x_nchw, (0, 2, 3, 1)).astype(jnp.bfloat16)    # NHWC bf16
    x = jnp.pad(x, ((0, 0), (pad, pad), (0, Wp - W), (0, 0)))       # rows + right cols
    x = x.reshape(B, (H + 2 * pad) * Wp, c1)
    x = jnp.pad(x, ((0, 0), (pad, pad + (Pout_p - Pout)), (0, 0)))  # guards + tile pad
    # TODO(synk): when chaining Conv layers, keep this padded-flat bf16 layout between
    # layers to avoid the extra pad / crop / transpose HBM passes.

    # Static tap offsets (all in [0, halo]).
    taps = tuple((pad + dy) * Wp + (dx + pad)
                 for dy in range(-pad, pad + 1)
                 for dx in range(-pad, pad + 1))

    per_tap = (k > 1) and (c1 >= 128)
    kernel = functools.partial(conv_bn_act_kernel, taps=taps, tm=TM, halo=halo,
                               c1=c1, apply_act=bool(act), per_tap=per_tap)

    cost = pl.CostEstimate(
        flops=2 * B * Pout_p * kdim * c2p,
        transcendentals=(B * Pout_p * c2p) if act else 0,
        bytes_accessed=int(x.size * 2 + w.size * 2 + bias.size * 4
                           + B * Pout_p * c2p * 2),
    )

    # VMEM budget: 2x bf16 image block + 2x bf16 out tile + weight/bias + f32 headroom.
    est = (2 * (Pf_p * c1 * 2 + TM * c2p * 2 + kdim * c2p * 2 + c2p * 4)
           + 3 * TM * max(c2p, kdim) * 4)
    vmem_limit = int(min(56 * 2**20, max(est + (4 << 20), 16 << 20)))

    out = pl.pallas_call(
        kernel,
        out_shape=jax.ShapeDtypeStruct((B, Pout_p, c2p), jnp.bfloat16),
        grid=(B, n_tiles),
        in_specs=[
            pl.BlockSpec((1, Pf_p, c1), lambda b, m: (b, 0, 0)),   # resident across tiles
            pl.BlockSpec((kdim, c2p), lambda b, m: (0, 0)),
            pl.BlockSpec((1, c2p), lambda b, m: (0, 0)),
        ],
        out_specs=pl.BlockSpec((1, TM, c2p), lambda b, m: (b, m, 0)),
        compiler_params=pltpu.CompilerParams(
            dimension_semantics=("parallel", "parallel"),
            vmem_limit_bytes=vmem_limit),
        cost_estimate=cost,
    )(x, w, bias)

    # Drop tile padding, per-row pad columns and channel padding; back to NCHW (bf16).
    out = out[:, :Pout].reshape(B, H, Wp, c2p)[:, :, :W, :c2]
    return jnp.transpose(out, (0, 3, 1, 2))


# ---------------------------------------------------------------------------
# Pure-JAX reference (same bf16-operand / f32-accumulate conv) for validation.
# ---------------------------------------------------------------------------
def conv_reference(x_nchw, conv_weight, bn_gamma, bn_beta, bn_mean, bn_var,
                   *, k, act=True, eps=1e-5):
    scale = bn_gamma / jnp.sqrt(bn_var + eps)
    bias = bn_beta - bn_mean * scale
    w_hwio = (jnp.transpose(conv_weight, (2, 3, 1, 0)) * scale).astype(jnp.bfloat16)
    x = jnp.transpose(x_nchw, (0, 2, 3, 1)).astype(jnp.bfloat16)
    y = lax.conv_general_dilated(x, w_hwio, (1, 1), 'SAME',
                                 dimension_numbers=('NHWC', 'HWIO', 'NHWC'),
                                 preferred_element_type=jnp.float32)
    y = y + bias
    if act:
        y = y * jax.nn.sigmoid(y)
    return jnp.transpose(y, (0, 3, 1, 2))


def _rel_err(out_bf16, ref_f32):
    out = out_bf16.astype(jnp.float32)
    return float(jnp.max(jnp.abs(out - ref_f32) / (1.0 + jnp.abs(ref_f32))))


if __name__ == "__main__":
    key = jax.random.PRNGKey(0)
    kx, kw3, kg, kb, km, kv, kw1 = jax.random.split(key, 7)

    B, c1, H, W = 2, 4, 16, 16
    x = jax.random.normal(kx, (B, c1, H, W), jnp.float32)

    # --- 3x3 Conv + BN + SiLU ---
    c2 = 16
    w3 = 0.2 * jax.random.normal(kw3, (c2, c1, 3, 3), jnp.float32)
    gamma = 1.0 + 0.1 * jax.random.normal(kg, (c2,), jnp.float32)
    beta = 0.1 * jax.random.normal(kb, (c2,), jnp.float32)
    mean = 0.1 * jax.random.normal(km, (c2,), jnp.float32)
    var = 0.5 + jnp.abs(jax.random.normal(kv, (c2,), jnp.float32))

    out3 = jax.block_until_ready(conv_pallas(x, w3, gamma, beta, mean, var, k=3))
    assert out3.shape == (B, c2, H, W)
    ref3 = conv_reference(x, w3, gamma, beta, mean, var, k=3)
    err3 = _rel_err(out3, ref3)

    # --- 1x1 Conv + BN + SiLU (the Conv() default, k=1) ---
    c2b = 32
    w1 = 0.3 * jax.random.normal(kw1, (c2b, c1, 1, 1), jnp.float32)
    g1 = jnp.ones((c2b,), jnp.float32)
    z1 = jnp.zeros((c2b,), jnp.float32)
    v1 = jnp.ones((c2b,), jnp.float32)

    out1 = jax.block_until_ready(conv_pallas(x, w1, g1, z1, z1, v1, k=1))
    assert out1.shape == (B, c2b, H, W)
    ref1 = conv_reference(x, w1, g1, z1, z1, v1, k=1)
    err1 = _rel_err(out1, ref1)

    # bf16 output + approx reciprocal => compare with a relative tolerance.
    if err3 < 2e-2 and err1 < 2e-2:
        print("KERNEL_OK")
    else:
        raise SystemExit(f"kernel/reference mismatch: k=3 err={err3}, k=1 err={err1}")
</pallas_src>

<mosaic_0001>
module attributes {stable_mosaic.version = 11 : i64} {
  func.func @conv_bn_act_kernel(%arg0: i32, %arg1: i32, %arg2: memref<1x434x4xbf16, #tpu.memory_space<vmem>>, %arg3: memref<36x128xbf16, #tpu.memory_space<vmem>>, %arg4: memref<1x128xf32, #tpu.memory_space<vmem>>, %arg5: memref<1x192x128xbf16, #tpu.memory_space<vmem>>) attributes {dimension_semantics = [#tpu.dimension_semantics<parallel>, #tpu.dimension_semantics<parallel>], iteration_bounds = array<i64: 2, 2>, scalar_prefetch = 0 : i64, scratch_operands = 0 : i64, tpu.core_type = #tpu.core_type<tc>, window_params = [{transform_indices = @transform_0, window_bounds = array<i64: 1, 434, 4>}, {pipeline_mode = #tpu.pipeline_mode<synchronous>, transform_indices = @transform_1, window_bounds = array<i64: 36, 128>}, {pipeline_mode = #tpu.pipeline_mode<synchronous>, transform_indices = @transform_2, window_bounds = array<i64: 1, 128>}, {transform_indices = @transform_3, window_bounds = array<i64: 1, 192, 128>}]} {
    %c192_i32 = arith.constant 192 : i32
    %0 = arith.muli %arg1, %c192_i32 : i32
    %1 = tpu.assume_multiple %0, 8 : i32
    %c0 = arith.constant 0 : index
    %2 = arith.index_cast %1 : i32 to index
    %c0_0 = arith.constant 0 : index
    %3 = vector.load %arg2[%c0, %2, %c0_0] : memref<1x434x4xbf16, #tpu.memory_space<vmem>>, vector<1x242x4xbf16>
    %4 = vector.shape_cast %3 : vector<1x242x4xbf16> to vector<242x4xbf16>
    %5 = vector.extract_strided_slice %4 {offsets = [0, 0], sizes = [192, 4], strides = [1, 1]} : vector<242x4xbf16> to vector<192x4xbf16>
    %6 = vector.extract_strided_slice %4 {offsets = [1, 0], sizes = [192, 4], strides = [1, 1]} : vector<242x4xbf16> to vector<192x4xbf16>
    %7 = vector.extract_strided_slice %4 {offsets = [2, 0], sizes = [192, 4], strides = [1, 1]} : vector<242x4xbf16> to vector<192x4xbf16>
    %8 = vector.extract_strided_slice %4 {offsets = [24, 0], sizes = [192, 4], strides = [1, 1]} : vector<242x4xbf16> to vector<192x4xbf16>
    %9 = vector.extract_strided_slice %4 {offsets = [25, 0], sizes = [192, 4], strides = [1, 1]} : vector<242x4xbf16> to vector<192x4xbf16>
    %10 = vector.extract_strided_slice %4 {offsets = [26, 0], sizes = [192, 4], strides = [1, 1]} : vector<242x4xbf16> to vector<192x4xbf16>
    %11 = vector.extract_strided_slice %4 {offsets = [48, 0], sizes = [192, 4], strides = [1, 1]} : vector<242x4xbf16> to vector<192x4xbf16>
    %12 = vector.extract_strided_slice %4 {offsets = [49, 0], sizes = [192, 4], strides = [1, 1]} : vector<242x4xbf16> to vector<192x4xbf16>
    %13 = vector.extract_strided_slice %4 {offsets = [50, 0], sizes = [192, 4], strides = [1, 1]} : vector<242x4xbf16> to vector<192x4xbf16>
    %14 = tpu.concatenate %5, %6, %7, %8, %9, %10, %11, %12, %13 in 1 : vector<192x4xbf16>, vector<192x4xbf16>, vector<192x4xbf16>, vector<192x4xbf16>, vector<192x4xbf16>, vector<192x4xbf16>, vector<192x4xbf16>, vector<192x4xbf16>, vector<192x4xbf16> -> vector<192x36xbf16>
    %c0_1 = arith.constant 0 : index
    %c0_2 = arith.constant 0 : index
    %15 = vector.load %arg3[%c0_1, %c0_2] : memref<36x128xbf16, #tpu.memory_space<vmem>>, vector<36x128xbf16>
    %cst = arith.constant dense<0.000000e+00> : vector<192x128xf32>
    %16 = tpu.matmul %14, %15, %cst {dimension_numbers = #tpu.dot_dimension_numbers<[1], [0], [0], [1], [0, 0, 1, 1], [], []>} : vector<192x36xbf16>, vector<36x128xbf16>, vector<192x128xf32> -> vector<192x128xf32>
    %c0_3 = arith.constant 0 : index
    %c0_4 = arith.constant 0 : index
    %17 = vector.load %arg4[%c0_3, %c0_4] : memref<1x128xf32, #tpu.memory_space<vmem>>, vector<1x128xf32>
    %18 = vector.broadcast %17 : vector<1x128xf32> to vector<192x128xf32>
    %19 = arith.addf %16, %18 : vector<192x128xf32>
    %cst_5 = arith.constant 0.000000e+00 : f32
    %20 = vector.broadcast %cst_5 : f32 to vector<192x128xf32>
    %21 = arith.subf %20, %19 : vector<192x128xf32>
    %22 = math.exp %21 : vector<192x128xf32>
    %cst_6 = arith.constant 1.000000e+00 : f32
    %23 = vector.broadcast %cst_6 : f32 to vector<192x128xf32>
    %24 = arith.addf %23, %22 : vector<192x128xf32>
    %25 = tpu.reciprocal %24 {approx = true} : vector<192x128xf32> -> vector<192x128xf32>
    %26 = arith.mulf %19, %25 : vector<192x128xf32>
    %27 = arith.truncf %26 : vector<192x128xf32> to vector<192x128xbf16>
    %c0_7 = arith.constant 0 : index
    %c0_8 = arith.constant 0 : index
    %c0_9 = arith.constant 0 : index
    %28 = vector.load %arg5[%c0_7, %c0_8, %c0_9] : memref<1x192x128xbf16, #tpu.memory_space<vmem>>, vector<1x192x128xbf16>
    %29 = vector.shape_cast %28 : vector<1x192x128xbf16> to vector<192x128xbf16>
    %30 = vector.shape_cast %27 : vector<192x128xbf16> to vector<1x192x128xbf16>
    tpu.vector_store %arg5[%c0_7, %c0_8, %c0_9], %30 {strides = array<i32>} : memref<1x192x128xbf16, #tpu.memory_space<vmem>>, vector<1x192x128xbf16>,
    return
  }
  func.func @transform_0(%arg0: i32, %arg1: i32) -> (i32, i32, i32) {
    %c0_i32 = arith.constant 0 : i32
    %c0_i32_0 = arith.constant 0 : i32
    %c0_i32_1 = arith.constant 0 : i32
    return %arg0, %c0_i32, %c0_i32_0 : i32, i32, i32
  }
  func.func @transform_1(%arg0: i32, %arg1: i32) -> (i32, i32) {
    %c0_i32 = arith.constant 0 : i32
    %c0_i32_0 = arith.constant 0 : i32
    %c0_i32_1 = arith.constant 0 : i32
    return %c0_i32, %c0_i32_0 : i32, i32
  }
  func.func @transform_2(%arg0: i32, %arg1: i32) -> (i32, i32) {
    %c0_i32 = arith.constant 0 : i32
    %c0_i32_0 = arith.constant 0 : i32
    %c0_i32_1 = arith.constant 0 : i32
    return %c0_i32, %c0_i32_0 : i32, i32
  }
  func.func @transform_3(%arg0: i32, %arg1: i32) -> (i32, i32, i32) {
    %c0_i32 = arith.constant 0 : i32
    %c0_i32_0 = arith.constant 0 : i32
    return %arg0, %arg1, %c0_i32 : i32, i32, i32
  }
}

</mosaic_0001>

<bundles_post_ra>
// kernel: tpu_custom_call.1
= control target key start
LH: loop header
LB: loop body
LE: loop exit
PB: predicated region body
PF: predicated region fallthrough
CT: control target
= control target key end

     0   :  { %8 = vsyncpa [#allocation3], 0  ;;  %s3125_s0 = inlined_call_operand.vmem [shape: bf16[2,434,4], index: 0, kind: input, shape index: {}]   ;;  %s3126_s1 = inlined_call_operand.vmem [shape: bf16[36,128], index: 1, kind: input, shape index: {}]   ;;  %s3127_s2 = inlined_call_operand.vmem [shape: f32[1,128], index: 2, kind: input, shape index: {}]   ;;  %s3128_s3 = inlined_call_operand.hbm [shape: bf16[2,384,128], index: 3, kind: output, shape index: {}]  }
   0x1   :  { %10 = vsyncpa [#allocation3 + $0x1], 0  ;;  %s2103_s12 = smov 0   ;;  %s2105_s13 = smov 0  }
   0x2   :  { %s2107_s14 = smov 0   ;;  %s2109_s15 = smov 0  }
   0x3   :  { %s2111_s16 = smov 0   ;;  %s2113_s17 = smov 0  }
   0x4   :  { %s2115_s18 = smov 0   ;;  %s2117_s19 = smov 0  }
   0x5 LB: > { %s1537_s20 = sadd.s32 4294967295, %s2071_s19   ;;  %s1538_s21 = sadd.s32 4294967294, %s2071_s19   ;;  %s2071_s19 = sphi %s2117_s19, %s16_s19   ;;  %s2067_s18 = sphi %s2115_s18, %s3213_s18   ;;  %s2063_s17 = sphi %s2113_s17, %s3212_s17   ;;  %s2059_s16 = sphi %s2111_s16, %s3211_s16   ;;  %s2055_s15 = sphi %s2109_s15, %s3210_s15   ;;  %s2051_s14 = sphi %s2107_s14, %s3209_s14   ;;  %s2047_s13 = sphi %s2105_s13, %s3208_s13   ;;  %s2043_s12 = sphi %s2103_s12, %s3207_s12  }
   0x6   : > { %s25_s22 = sadd.s32 1, %s2063_s17  ;;  %s28_s23 = sadd.s32 1, %s2067_s18 }
   0x7   : > { %p26_p0 = scmp.ge.s32.totalorder %s25_s22, 2  ;;  %p115_p1 = scmp.ne.s32.totalorder %s2051_s14, %s2047_s13 }
   0x8   : > { %p116_p2 = scmp.eq.s32.totalorder %s1537_s20, 3  ;;  %p121_p5 = scmp.ne.s32.totalorder %s2047_s13, %s2043_s12 }
   0x9   : > { %s3215_s22 = smov (%p26_p0, %s25_s22), 0  ;;  %s3217_s23 = smov (!%p26_p0, %s28_s23), %s2067_s18 }
   0xa   : > { %s101_s24 = ssub.s32 %s2063_s17, %s3215_s22  ;;  %p2154_p3 = por %p116_p2, %p115_p1 }
   0xb   : > { %p30_p4 = scmp.ge.s32.totalorder %s3217_s23, 2  ;;  %p122_p6 = scmp.eq.s32.totalorder %s1538_s21, 3 }
   0xc   : > { %p1541_p7 = scmp.ge.s32.totalorder %s2071_s19, 1  ;;  %p154_p9 = scmp.lt.s32.totalorder %s2071_s19, 5 }
   0xd   : > { %s3219_s23 = smov (%p30_p4, %s3217_s23), 0  ;;  %p2163_p8 = por %p122_p6, %p121_p5 }
   0xe   : > { %s100_s27 = ssub.s32 %s2067_s18, %s3219_s23  ;;  %s105_s28 = sadd.s32 1, %s2051_s14 }
   0xf   : > { %s102_s29 = sor.u32 %s101_s24, %s100_s27  ;;  %p155_p10 = pnand %p1541_p7, %p154_p9 }
  0x10   : > { %p103_p11 = scmp.eq.s32.totalorder %s102_s29, 0 }
  0x11   : > { %158 = sbr.rel (%p155_p10) target bundleno = 608 (0x260), region = 32 }
  0x12   : > { %s2172_s30 = scalar_select %p103_p11, %s2051_s14, %s105_s28  }
  0x18   : > { %p178_p12 = scmp.lt.s32.totalorder %s2059_s16, 1  ;;  %s185_s4 = smul.u32 192, %s2055_s15  ;;  %vm409_vm0 = vcmask 1046528   ;;  %vm284_vm1 = vsmask.f32 7424  ;;  %vm1046_vm2 = vcmask 1041408  }
  0x19   : > { %s2073_s21 = smov 12   ;;  %s2074_s24 = smov 8   ;;  %vm794_vm3 = vcmask 31744   ;;  %vm819_vm4 = vcmask 64512   ;;  %vm844_vm5 = vcmask 97280   ;;  %vm869_vm6 = vcmask 130048  }
  0x1a   : > { %s179_s5 = scalar_select %p178_p12, %s2059_s16, 1  ;;  %vm894_vm7 = vcmask 162816   ;;  %vm919_vm8 = vcmask 195584   ;;  %vm944_vm9 = vcmask 228352   ;;  %vm969_vm10 = vcmask 261120  }
  0x1b   : > { %s186_s6 = sshra.s32 %s185_s4, 3  ;;  %s2075_s27 = smov 4   ;;  %vm1021_vm11 = vcmask 293888  }
  0x1c   : > { %s1766_s7 = smul.u32 220, %s179_s5  ;;  %s1543_s8 = sshll.u32 %s186_s6, 2 }
  0x1d   : > { %s2076_s28 = smov 16   ;;  %s2077_s29 = smov 20  }
  0x1e   : > { %s182_s11 = scalar_lea.vmem %s3125_s0, %s1766_s7  ;;  %s2078_s6 = smov 24  }
  0x1f   : > { %s2180_s20 = scalar_lea.vmem %s182_s11, %s1543_s8  ;;  %s2079_s9 = smov 28  }
  0x20   : > { %v205_v0 = vld [vmem:[%s2180_s20 + $0x3c] sm:$0xf]  ;;  %v206_v1 = vld [vmem:[%s2180_s20 + $0x40] sm:$0xf]  ;;  %v207_v2 = vld [vmem:[%s2180_s20 + $0x44] sm:$0xf] }
  0x21   : > { %v2185_v3 = vcombine.low %v206_v1, %v207_v2  ;;  %v2187_v4 = vcombine.low %v205_v0, %v206_v1  ;;  %v2190_v5 = vld [vmem:[%s2180_s20 + $0x38] sm:$0xf]  ;;  %v193_v6 = vld [vmem:[%s2180_s20 + $0xc] sm:$0xf]  ;;  %v194_v7 = vld [vmem:[%s2180_s20 + $0x10] sm:$0xf] }
  0x22   : > { %v2195_v8 = vcombine.low %v2190_v5, %v205_v0  ;;  %v195_v9 = vld [vmem:[%s2180_s20 + $0x14] sm:$0xf]  ;;  %v2198_v10 = vcombine.low %v193_v6, %v194_v7  ;;  %v192_v11 = vld [vmem:[%s2180_s20 + $0x8] sm:$0xf]  ;;  %v2202_v12 = vld [vmem:[%s2180_s20 + $0x30] sm:$0xf] }
  0x23   : > { %3159 = vst [vmem:[#allocation5_spill] sm:$0xff] %v2185_v3  ;;  %487 = vrot.lane.b32.xlu1 %v2187_v4, %s2073_s21  ;;  %v2206_v13 = vcombine.low %v194_v7, %v195_v9  ;;  %v2208_v14 = vcombine.low %v192_v11, %v193_v6  ;;  %v2211_v15 = vld [vmem:[%s2180_s20 + $0x34] sm:$0xf]  ;;  %v2221_v18 = vld [vmem:[%s2180_s20] sm:$0xff]   ;;  %v425_v19 = vrot.slane %v2185_v3, 1  ;;  %v349_v38 = vshll.u32 %v2185_v3, 16 }
  0x24   : > { %3160 = vst [vmem:[#allocation6_spill] sm:$0xff] %v2195_v8  ;;  %475 = vrot.lane.b32.xlu0 %v2198_v10, %s2073_s21  ;;  %v2217_v16 = vcombine.low %v2202_v12, %v2211_v15  ;;  %v423_v17 = vrot.slane %v2195_v8, 1  ;;  %3163 = vst [vmem:[#allocation9_spill] sm:$0xff] %v2221_v18  ;;  %v341_v23 = vshll.u32 %v2195_v8, 16  ;;  %v410_v25 = vrot.slane %v2221_v18, 1  ;;  %s1451_s5 = smul.u32 24, %s2055_s15 }
  0x25   : > { %3161 = vst [vmem:[#allocation7_spill] sm:$0xff] %v2206_v13  ;;  %3162 = vst [vmem:[#allocation8_spill] sm:$0xff] %v2208_v14  ;;  %v411_v20 = vrot.slane %v2208_v14, 1  ;;  %v413_v21 = vrot.slane %v2206_v13, 1  ;;  %v293_v22 = vshll.u32 %v2208_v14, 16  ;;  %v297_v26 = vshrl.u32 %v2208_v14, 16 }
  0x26   : > { %v3133_v24 = vrot.slane %v2217_v16, 1  ;;  %v301_v27 = vshll.u32 %v2206_v13, 16  ;;  %v286_v29 = vshrl.u32 %v2221_v18, 16  ;;  %v288_v30 = vshll.u32 %v2221_v18, 16  ;;  %v208_v43 = vld [vmem:[%s2180_s20 + $0x48] sm:$0xf] }
  0x27   : > { %v295_v28 = vrot.slane %v293_v22, 1  ;;  %v412_v32 = vsel %vm409_vm0, %v410_v25, %v411_v20  ;;  %v2243_v33 = vsel %vm409_vm0, %v423_v17, %v425_v19  ;;  %v414_v34 = vsel %vm409_vm0, %v411_v20, %v413_v21  ;;  %v196_v45 = vld [vmem:[%s2180_s20 + $0x18] sm:$0xf]  ;;  %v209_v47 = vld [vmem:[%s2180_s20 + $0x4c] sm:$0xf] }
  0x28   : > { %v2237_v31 = vsel %vm409_vm0, %v3133_v24, %v423_v17  ;;  %3165 = vst [vmem:[#allocation11_spill] sm:$0xff] %v2243_v33  ;;  %435 = vrot.lane.b32.xlu0 %v412_v32, %s2074_s24  ;;  %v290_v35 = vrot.slane %v288_v30, 1  ;;  %v343_v36 = vrot.slane %v341_v23, 1  ;;  %v345_v37 = vshrl.u32 %v2195_v8, 16  ;;  %v210_v48 = vld [vmem:[%s2180_s20 + $0x50] sm:$0xf] }
  0x29   : > { %3164 = vst [vmem:[#allocation10_spill] sm:$0xff] %v2237_v31  ;;  %447 = vrot.lane.b32.xlu1 %v2237_v31, %s2074_s24  ;;  %v299_v39 = vor.u32 %v297_v26, %v295_v28  ;;  %v2253_v40 = vrot.slane %v301_v27, 1  ;;  %v333_v41 = vshll.u32 %v2217_v16, 16  ;;  %v337_v42 = vshrl.u32 %v2217_v16, 16  ;;  %v197_v52 = vld [vmem:[%s2180_s20 + $0x1c] sm:$0xf] }
  0x2a   : > { %v291_v44 = vor.u32 %v290_v35, %v286_v29  ;;  %v347_v49 = vor.u32 %v345_v37, %v343_v36  ;;  %v2266_v50 = vrot.slane %v349_v38, 1  ;;  %v2268_v51 = vcombine.low %v207_v2, %v208_v43  ;;  %v198_v53 = vld [vmem:[%s2180_s20 + $0x20] sm:$0xf]  ;;  %v2304_v22 = vld [vmem:[%s2180_s20 + $0x54] sm:$0xf] }
  0x2b   : > { %v2259_v46 = vrot.slane %v333_v41, 1  ;;  %v550_v54 = vshll.u32 %v2187_v4, 16  ;;  %v304_v55 = vsel %vm284_vm1, %v299_v39, %v2253_v40  ;;  %v2277_v58 = vcombine.low %v195_v9, %v196_v45  ;;  %v199_v29 = vld [vmem:[%s2180_s20 + $0x24] sm:$0xf]  ;;  %v216_v24 = vld [vmem:[%s2180_s20 + $0x68] sm:$0xf] }
  0x2c   : > { %437 = vrot.lane.b32.xlu0 %v414_v34, %s2074_s24  ;;  %v296_v56 = vsel %vm284_vm1, %v291_v44, %v295_v28  ;;  %v2279_v59 = vcombine.low %v209_v47, %v210_v48  ;;  %v505_v60 = vshll.u32 %v2198_v10, 16  ;;  %v2282_v61 = vcombine.low %v208_v43, %v209_v47  ;;  %v213_v47 = vld [vmem:[%s2180_s20 + $0x5c] sm:$0xf] }
  0x2d   : > { %449 = vrot.lane.b32.xlu1 %v2243_v33, %s2074_s24  ;;  %v339_v57 = vor.u32 %v337_v42, %v2259_v46  ;;  %v2284_v62 = vcombine.low %v197_v52, %v198_v53  ;;  %v2290_v63 = vsel %vm284_vm1, %v347_v49, %v2266_v50  ;;  %v2292_v0 = vrot.slane %v550_v54, 1  ;;  %v212_v42 = vld [vmem:[%s2180_s20 + $0x58] sm:$0xf] }
  0x2e   : > { %3166 = vst [vmem:[#allocation12_spill] sm:$0xff] %v2282_v61  ;;  %3167 = vst [vmem:[#allocation13_spill] sm:$0xff] %v2290_v63  ;;  %v554_v1 = vshrl.u32 %v2187_v4, 16  ;;  %v558_v2 = vshll.u32 %v2268_v51, 16  ;;  %v503_v7 = vshrl.u32 %v2198_v10, 16  ;;  %v507_v9 = vrot.slane %v505_v60, 1 }
  0x2f   : > { %v2297_v6 = vsel %vm284_vm1, %v339_v57, %v343_v36  ;;  %v510_v11 = vshll.u32 %v2277_v58, 16  ;;  %v562_v17 = vshrl.u32 %v2268_v51, 16  ;;  %v566_v20 = vshll.u32 %v2279_v59, 16 }
  0x30   : > { %385 = vrot.lane.b32.xlu0 %v296_v56, %s2075_s27  ;;  %3168 = vst [vmem:[#allocation14_spill] sm:$0xff] %v2297_v6  ;;  %v514_v23 = vshrl.u32 %v2277_v58, 16  ;;  %v518_v25 = vshll.u32 %v2284_v62, 16  ;;  %v2312_v26 = vcombine.low %v196_v45, %v197_v52  ;;  %v556_v27 = vor.u32 %v554_v1, %v2292_v0 }
  0x31   : > { %387 = vrot.lane.b32.xlu1 %v304_v55, %s2075_s27  ;;  %v560_v28 = vrot.slane %v558_v2, 1  ;;  %v508_v30 = vor.u32 %v507_v9, %v503_v7  ;;  %v512_v32 = vrot.slane %v510_v11, 1  ;;  %v2317_v34 = vcombine.low %v210_v48, %v2304_v22  ;;  %v200_v48 = vld [vmem:[%s2180_s20 + $0x28] sm:$0xf]  ;;  %v201_v55 = vld [vmem:[%s2180_s20 + $0x2c] sm:$0xf] }
  0x32   : > { %3169 = vst [vmem:[#allocation15_spill] sm:$0xff] %v2312_v26  ;;  %v357_v35 = vshll.u32 %v2282_v61, 16  ;;  %v2320_v37 = vrot.slane %v566_v20, 1  ;;  %v2322_v39 = vrot.slane %v518_v25, 1  ;;  %v2324_v41 = vcombine.low %v198_v53, %v199_v29 }
  0x33   : > { %v564_v36 = vor.u32 %v562_v17, %v560_v28  ;;  %v516_v38 = vor.u32 %v514_v23, %v512_v32  ;;  %v561_v43 = vsel %vm284_vm1, %v556_v27, %v560_v28  ;;  %v3131_v44 = vrot.slane %v2187_v4, 1 }
  0x34   : > { %397 = vrot.lane.b32.xlu0 %v2297_v6, %s2075_s27  ;;  %v309_v45 = vshll.u32 %v2312_v26, 16  ;;  %v513_v49 = vsel %vm284_vm1, %v508_v30, %v512_v32  ;;  %v2337_v52 = vrot.slane %v357_v35, 1  ;;  %v361_v53 = vshrl.u32 %v2282_v61, 16 }
  0x35   : > { %399 = vrot.lane.b32.xlu1 %v2290_v63, %s2075_s27  ;;  %v365_v54 = vshll.u32 %v2317_v34, 16  ;;  %v569_v56 = vsel %vm284_vm1, %v564_v36, %v2320_v37  ;;  %v639_v57 = vrot.slane %v2268_v51, 1  ;;  %v626_v60 = vrot.slane %v2198_v10, 1 }
  0x36   : > { %v627_v1 = vrot.slane %v2277_v58, 1  ;;  %v521_v2 = vsel %vm284_vm1, %v516_v38, %v2322_v39  ;;  %v3130_v7 = vrot.slane %v2279_v59, 1  ;;  %v3129_v9 = vrot.slane %v2284_v62, 1 }
  0x37   : > { %v317_v11 = vshll.u32 %v2324_v41, 16  ;;  %v2354_v17 = vrot.slane %v309_v45, 1  ;;  %v313_v10 = vshrl.u32 %v2312_v26, 16  ;;  %v363_v20 = vor.u32 %v361_v53, %v2337_v52 }
  0x38   : > { %477 = vrot.lane.b32.xlu0 %v2277_v58, %s2073_s21  ;;  %v2359_v58 = vcombine.low %v200_v48, %v201_v55  ;;  %v367_v23 = vrot.slane %v365_v54, 1  ;;  %v369_v25 = vshrl.u32 %v2317_v34, 16  ;;  %v427_v27 = vrot.slane %v2282_v61, 1 }
  0x39   : > { %489 = vrot.lane.b32.xlu1 %v2268_v51, %s2073_s21  ;;  %v2357_v51 = vcombine.low %v212_v42, %v213_v47  ;;  %v640_v28 = vsel %vm409_vm0, %v3131_v44, %v639_v57  ;;  %v628_v30 = vsel %vm409_vm0, %v626_v60, %v627_v1  ;;  %v321_v32 = vshrl.u32 %v2324_v41, 16 }
  0x3a   : > { %v3132_v35 = vrot.slane %v2312_v26, 1  ;;  %v642_v36 = vsel %vm409_vm0, %v639_v57, %v3130_v7  ;;  %v630_v38 = vsel %vm409_vm0, %v627_v1, %v3129_v9  ;;  %v2379_v45 = vsel %vm409_vm0, %v425_v19, %v427_v27 }
  0x3b   : > { %v315_v53 = vor.u32 %v313_v10, %v2354_v17  ;;  %v373_v54 = vshll.u32 %v2357_v51, 16  ;;  %v325_v57 = vshll.u32 %v2359_v58, 16  ;;  %v2397_v19 = vsel %vm284_vm1, %v363_v20, %v367_v23 }
  0x3c   : > { %602 = vrot.lane.b32.xlu0 %v513_v49, %s2076_s28  ;;  %v2382_v49 = vld [vmem:[%s2180_s20 + $0x60] sm:$0xf]  ;;  %v2394_v60 = vsel %vm409_vm0, %v413_v21, %v3132_v35  ;;  %v2399_v1 = vor.u32 %v369_v25, %v367_v23  ;;  %v3135_v10 = vrot.slane %v2317_v34, 1  ;;  %v2413_v21 = vcombine.low %v201_v55, %v2202_v12 }
  0x3d   : > { %614 = vrot.lane.b32.xlu1 %v561_v43, %s2076_s28  ;;  %v319_v43 = vrot.slane %v317_v11, 1  ;;  %v2410_v9 = vcombine.low %v213_v47, %v2382_v49  ;;  %v327_v44 = vrot.slane %v325_v57, 1  ;;  %v353_v18 = vshrl.u32 %v2185_v3, 16 }
  0x3e   : > { %v534_v47 = vshll.u32 %v2413_v21, 16 }
  0x3f   : > { %v2406_v11 = vor.u32 %v321_v32, %v319_v43  ;;  %v582_v12 = vshll.u32 %v2410_v9, 16 }
  0x40   : > { %604 = vrot.lane.b32.xlu0 %v521_v2, %s2076_s28  ;;  %v2404_v2 = vcombine.low %v199_v29, %v200_v48  ;;  %v2422_v29 = vsel %vm284_vm1, %v315_v53, %v319_v43  ;;  %v3137_v53 = vrot.slane %v2413_v21, 1 }
  0x41   : > { %616 = vrot.lane.b32.xlu1 %v569_v56, %s2076_s28  ;;  %v2402_v56 = vcombine.low %v2304_v22, %v212_v42  ;;  %v375_v42 = vrot.slane %v373_v54, 1  ;;  %v2432_v7 = vrot.slane %v582_v12, 1  ;;  %v215_v54 = vld [vmem:[%s2180_s20 + $0x64] sm:$0xf]  ;;  %v2448_v12 = vld [vmem:[%s2180_s20 + $0x6c] sm:$0xf] }
  0x42   : > { %v526_v23 = vshll.u32 %v2404_v2, 16  ;;  %v530_v22 = vshrl.u32 %v2404_v2, 16  ;;  %v3136_v43 = vrot.slane %v2404_v2, 1 }
  0x43   : > { %v574_v20 = vshll.u32 %v2402_v56, 16  ;;  %v578_v25 = vshrl.u32 %v2402_v56, 16  ;;  %v3134_v32 = vrot.slane %v2402_v56, 1 }
  0x44   : > { %651 = vrot.lane.b32.xlu0 %v628_v30, %s2077_s29  ;;  %v2428_v55 = vrot.slane %v526_v23, 1  ;;  %v2434_v30 = vrot.slane %v534_v47, 1  ;;  %v3142_v47 = vrot.slane %v2359_v58, 1  ;;  %v2465_v57 = vsel %vm409_vm0, %v3136_v43, %v3137_v53 }
  0x45   : > { %663 = vrot.lane.b32.xlu1 %v640_v28, %s2077_s29  ;;  %v2426_v48 = vrot.slane %v574_v20, 1  ;;  %v3138_v28 = vrot.slane %v2410_v9, 1  ;;  %v2442_v20 = vsel %vm409_vm0, %v427_v27, %v3135_v10  ;;  %v2481_v10 = vrot.slane %v2357_v51, 1 }
  0x46   : > { %v532_v35 = vor.u32 %v530_v22, %v2428_v55  ;;  %v2477_v22 = vcombine.low %v2382_v49, %v215_v54  ;;  %v2484_v53 = vcombine.low %v216_v24, %v2448_v12 }
  0x47   : > { %v580_v23 = vor.u32 %v578_v25, %v2426_v48  ;;  %v2458_v27 = vsel %vm409_vm0, %v3134_v32, %v3138_v28  ;;  %v329_v32 = vshrl.u32 %v2359_v58, 16  ;;  %v3170_v28 = vrot.slane %v2217_v16, 1 }
  0x48   : > { %653 = vrot.lane.b32.xlu0 %v630_v38, %s2077_s29  ;;  %v2474_v25 = vsel %vm284_vm1, %v532_v35, %v2434_v30  ;;  %v1876_v35 = vld [vmem:[%s3126_s1] sm:$0xff]   ;;  %v710_v33 = vshll.u32 %v2477_v22, 16  ;;  %v714_v14 = vshrl.u32 %v2477_v22, 16  ;;  %v3153_v8 = vrot.slane %v2484_v53, 1 }
  0x49   : > { %665 = vrot.lane.b32.xlu1 %v642_v36, %s2077_s29  ;;  %v377_v36 = vshrl.u32 %v2357_v51, 16  ;;  %v2470_v38 = vsel %vm284_vm1, %v580_v23, %v2432_v7  ;;  %v2491_v23 = vsel %vm409_vm0, %v3142_v47, %v3170_v28  ;;  %v331_v63 = vor.u32 %v329_v32, %v327_v44  ;;  %1727 = vmatprep.subr.bf16.mxu0 %v1876_v35 }
  0x4a   : > { %3171 = vst [vmem:[#allocation16_spill] sm:$0xff] %v2491_v23  ;;  %v718_v47 = vshll.u32 %v2484_v53, 16  ;;  %v1556_v32 = vcombine.low %v2382_v49, %v2382_v49  ;;  %v712_v31 = vrot.slane %v710_v33, 1  ;;  %1757 = vmatprep.subr.bf16.mxu1 %v1876_v35  ;;  %v305_v28 = vshrl.u32 %v2206_v13, 16  ;;  %1728 = vmatpush3.bf16.msra.mxu0 %v1876_v35 }
  0x4b   : > { %v379_v43 = vor.u32 %v377_v36, %v375_v42  ;;  %v762_v36 = vrot.slane %v2477_v22, 1  ;;  %v2511_v23 = vsel %vm284_vm1, %v331_v63, %v2259_v46  ;;  %1760 = vmatpush3.bf16.msra.mxu1 %v1876_v35  ;;  %v1877_v46 = vld [vmem:[%s3126_s1 + $0x8] sm:$0xff]   ;;  %v2530_v63 = vsel %vm284_vm1, %v2399_v1, %v375_v42 }
  0x4c   : > { %682 = vrot.lane.b32.xlu0 %v2312_v26, %s2078_s6  ;;  %v2518_v6 = vrot.slane %v718_v47, 1  ;;  %v381_v33 = vshll.u32 %v1556_v32, 16  ;;  %v716_v47 = vor.u32 %v714_v14, %v712_v31  ;;  %v433_v3 = vrot.slane %v1556_v32, 1  ;;  %1729 = vmatprep.subr.bf16.mxu0 %v1877_v46 }
  0x4d   : > { %694 = vrot.lane.b32.xlu1 %v2282_v61, %s2078_s6  ;;  %v2515_v61 = vsel %vm409_vm0, %v2481_v10, %v762_v36  ;;  %v2523_v49 = vsel %vm409_vm0, %v762_v36, %v3153_v8  ;;  %v2533_v13 = vsel %vm284_vm1, %v379_v43, %v712_v31  ;;  %v2539_v36 = vcombine.low %v215_v54, %v216_v24 }
  0x4e   : > { %3172 = vst [vmem:[#allocation17_spill] sm:$0xff] %v2523_v49  ;;  %v383_v35 = vrot.slane %v381_v33, 1  ;;  %v2543_v8 = vcombine.low %v2211_v15, %v2190_v5  ;;  %v586_v1 = vshrl.u32 %v2410_v9, 16  ;;  %v2548_v42 = vsel %vm284_vm1, %v2406_v11, %v327_v44  ;;  %1758 = vmatprep.subr.bf16.mxu1 %v1877_v46  ;;  %1730 = vmatpush3.bf16.msra.mxu0 %v1877_v46  ;;  %v1880_v49 = vld [vmem:[%s2180_s20 + $0x78] ss:$0 sps:$4 sm:$0x11]  }
  0x4f   : > { %3173 = vst [vmem:[#allocation18_spill] sm:$0xff] %v2539_v36  ;;  %v2552_v14 = vsel %vm284_vm1, %v716_v47, %v2518_v6  ;;  %v2556_v31 = vsel %vm409_vm0, %v2481_v10, %v433_v3  ;;  %v538_v24 = vshrl.u32 %v2413_v21, 16  ;;  %v590_v44 = vshll.u32 %v2539_v36, 16  ;;  %1761 = vmatpush3.bf16.msra.mxu1 %v1877_v46 }
  0x50   : > { %684 = vrot.lane.b32.xlu0 %v2324_v41, %s2078_s6  ;;  %3174 = vst [vmem:[#allocation19_spill] sm:$0xff] %v2543_v8  ;;  %3175 = vst [vmem:[#allocation20_spill] sm:$0xff] %v2556_v31  ;;  %v2560_v5 = vsel %vm284_vm1, %v379_v43, %v383_v35  ;;  %v588_v15 = vor.u32 %v586_v1, %v2432_v7  ;;  %v542_v11 = vshll.u32 %v2543_v8, 16  ;;  %v594_v32 = vshrl.u32 %v2539_v36, 16 }
  0x51   : > { %696 = vrot.lane.b32.xlu1 %v2317_v34, %s2078_s6  ;;  %3176 = vst [vmem:[#allocation21_spill] sm:$0xff] %v2560_v5  ;;  %v540_v54 = vor.u32 %v538_v24, %v2434_v30  ;;  %v1569_v3 = vcombine.low %v2448_v12, %v2448_v12  ;;  %v546_v33 = vshrl.u32 %v2543_v8, 16  ;;  %v592_v7 = vrot.slane %v590_v44, 1  ;;  %v2583_v5 = vld [vmem:[%s2180_s20 + $0x70] sm:$0xff]   ;;  %s2080_s20 = smov 32  }
  0x52   : > { %v544_v43 = vrot.slane %v542_v11, 1  ;;  %v647_v46 = vrot.slane %v2539_v36, 1  ;;  %v635_v30 = vrot.slane %v2543_v8, 1  ;;  %v3177_v12 = vrot.slane %v2324_v41, 1 }
  0x53   : > { %v3178_v47 = vrot.slane %v2312_v26, 1  ;;  %v355_v1 = vor.u32 %v353_v18, %v2266_v50  ;;  %v598_v24 = vshll.u32 %v1569_v3, 16  ;;  %v649_v31 = vrot.slane %v1569_v3, 1  ;;  %v1879_v44 = vld [vmem:[%s3126_s1 + $0x10] ss:$0 sps:$4 sm:$0x33]  }
  0x54   : > { %738 = vrot.lane.b32.xlu0 %v2422_v29, %s2079_s9  ;;  %v2589_v11 = vsel %vm284_vm1, %v588_v15, %v592_v7  ;;  %v2592_v8 = vsel %vm284_vm1, %v540_v54, %v544_v43  ;;  %v596_v36 = vor.u32 %v594_v32, %v592_v7  ;;  %v548_v26 = vor.u32 %v546_v33, %v544_v43 }
  0x55   : > { %750 = vrot.lane.b32.xlu1 %v2397_v19, %s2079_s9  ;;  %v418_v35 = vsel %vm409_vm0, %v3178_v47, %v3177_v12  ;;  %v600_v12 = vrot.slane %v598_v24, 1  ;;  %v3179_v18 = vrot.slane %v2410_v9, 1  ;;  %v3180_v3 = vrot.slane %v2413_v21, 1  ;;  %1763 = vmatprep.subr.msk.bf16.mxu0 %vm1046_vm2, %v1879_v44 }
  0x56   : > { %v2606_v15 = vsel %vm409_vm0, %v647_v46, %v649_v31  ;;  %v307_v54 = vor.u32 %v305_v28, %v2253_v40  ;;  %v2615_v32 = vsel %vm284_vm1, %v548_v26, %v2292_v0  ;;  %v3181_v33 = vrot.slane %v2187_v4, 1  ;;  %1764 = vmatprep.subr.msk.bf16.mxu1 %vm1046_vm2, %v1879_v44 }
  0x57   : > { %v2598_v50 = vsel %vm409_vm0, %v3179_v18, %v647_v46  ;;  %v2603_v47 = vsel %vm409_vm0, %v3180_v3, %v635_v30  ;;  %v2623_v31 = vsel %vm284_vm1, %v596_v36, %v600_v12  ;;  %v722_v43 = vshrl.u32 %v2484_v53, 16 }
  0x58   : > { %740 = vrot.lane.b32.xlu0 %v2548_v42, %s2079_s9  ;;  %v2620_v7 = vsel %vm409_vm0, %v635_v30, %v3181_v33  ;;  %v726_v46 = vshll.u32 %v2583_v5, 16  ;;  %v1048_v40 = vsel %vm1046_vm2, %v1879_v44, 0  ;;  %v730_v0 = vshrl.u32 %v2583_v5, 16 }
  0x59   : > { %752 = vrot.lane.b32.xlu1 %v2530_v63, %s2079_s9  ;;  %1732 = vmatpush3.bf16.msra.mxu0 %v1048_v40  ;;  %v734_v26 = vshll.u32 %v1880_v49, 16  ;;  %v766_v4 = vrot.slane %v2583_v5, 1  ;;  %v724_v28 = vor.u32 %v722_v43, %v2518_v6  ;;  %v3182_v24 = vrot.slane %v2484_v53, 1 }
  0x5a   : > { %1762 = vmatpush3.bf16.msra.mxu1 %v1048_v40  ;;  %v728_v30 = vrot.slane %v726_v46, 1  ;;  %v2640_v12 = vsel %vm284_vm1, %v355_v1, %v2337_v52  ;;  %v312_v6 = vsel %vm284_vm1, %v307_v54, %v2354_v17  ;;  %v768_v33 = vrot.slane %v1880_v49, 1 }
  0x5b   : > { %v736_v36 = vrot.slane %v734_v26, 1  ;;  %v2636_v44 = vsel %vm409_vm0, %v3182_v24, %v766_v4  ;;  %v3183_v52 = vrot.slane %v2317_v34, 1  ;;  %v3184_v1 = vrot.slane %v2359_v58, 1  ;;  %v3195_v24 = vld [vmem:[#allocation20_spill] sm:$0xff] }
  0x5c   : > { %770 = vrot.lane.b32.xlu0 %v418_v35, %s2080_s20  ;;  %v2645_v18 = vsel %vm284_vm1, %v724_v28, %v728_v30  ;;  %v732_v3 = vor.u32 %v730_v0, %v728_v30  ;;  %v2654_v46 = vsel %vm409_vm0, %v766_v4, %v768_v33  ;;  %v3185_v49 = vrot.slane %v2324_v41, 1  ;;  %v3194_v28 = vld [vmem:[#allocation21_spill] sm:$0xff] }
  0x5d   : > { %782 = vrot.lane.b32.xlu1 %v2442_v20, %s2080_s20  ;;  %v432_v17 = vsel %vm409_vm0, %v3183_v52, %v2481_v10  ;;  %v570_v10 = vshrl.u32 %v2279_v59, 16  ;;  %v522_v40 = vshrl.u32 %v2284_v62, 16  ;;  %v3196_v52 = vld [vmem:[#allocation18_spill] sm:$0xff] }
  0x5e   : > { %v2648_v43 = vsel %vm284_vm1, %v732_v3, %v736_v36  ;;  %v420_v54 = vsel %vm409_vm0, %v3185_v49, %v3184_v1 }
  0x60   : > { %389 = vrot.lane.b32.xlu0 %v312_v6, %s2075_s27 }
  0x61   : > { %401 = vrot.lane.b32.xlu1 %v2640_v12, %s2075_s27 }
  0x64   : > { %772 = vrot.lane.b32.xlu0 %v420_v54, %s2080_s20 }
  0x65   : > { %784 = vrot.lane.b32.xlu1 %v432_v17, %s2080_s20 }
  0x68   : > { %391 = vrot.lane.b32.xlu0 %v2422_v29, %s2075_s27  ;;  %v524_v29 = vor.u32 %v522_v40, %v2322_v39  ;;  %v3187_v39 = vrot.slane %v2279_v59, 1  ;;  %v3198_v40 = vld [vmem:[#allocation9_spill] sm:$0xff] }
  0x69   : > { %403 = vrot.lane.b32.xlu1 %v2397_v19, %s2075_s27  ;;  %v572_v19 = vor.u32 %v570_v10, %v2320_v37  ;;  %v3186_v37 = vrot.slane %v2402_v56, 1 }
  0x6c   : > { %439 = vrot.lane.b32.xlu0 %v2394_v60, %s2074_s24  ;;  %v577_v60 = vsel %vm284_vm1, %v572_v19, %v2426_v48  ;;  %v3188_v48 = vrot.slane %v2404_v2, 1 }
  0x6d   : > { %451 = vrot.lane.b32.xlu1 %v2379_v45, %s2074_s24 }
  0x70   : > { %441 = vrot.lane.b32.xlu0 %v418_v35, %s2074_s24  ;;  %v644_v35 = vsel %vm409_vm0, %v3187_v39, %v3186_v37 }
  0x71   : > { %453 = vrot.lane.b32.xlu1 %v2442_v20, %s2074_s24  ;;  %v529_v20 = vsel %vm284_vm1, %v524_v29, %v2428_v55  ;;  %v3189_v55 = vrot.slane %v2284_v62, 1 }
  0x73   : > { %v632_v0 = vsel %vm409_vm0, %v3189_v55, %v3188_v48  ;;  %v3200_v55 = vld [vmem:[#allocation8_spill] sm:$0xff] }
  0x74   : > { %479 = vrot.lane.b32.xlu0 %v2284_v62, %s2073_s21 }
  0x75   : > { %491 = vrot.lane.b32.xlu1 %v2279_v59, %s2073_s21 }
  0x78   : > { %481 = vrot.lane.b32.xlu0 %v2404_v2, %s2073_s21 }
  0x79   : > { %493 = vrot.lane.b32.xlu1 %v2402_v56, %s2073_s21  ;;  %v3190_v56 = vld [vmem:[#allocation14_spill] sm:$0xff] }
  0x7c   : > { %606 = vrot.lane.b32.xlu0 %v529_v20, %s2076_s28 }
  0x7d   : > { %618 = vrot.lane.b32.xlu1 %v577_v60, %s2076_s28 }
  0x80   : > { %608 = vrot.lane.b32.xlu0 %v2474_v25, %s2076_s28 }
  0x81   : > { %620 = vrot.lane.b32.xlu1 %v2470_v38, %s2076_s28 }
  0x84   : > { %655 = vrot.lane.b32.xlu0 %v632_v0, %s2077_s29 }
  0x85   : > { %667 = vrot.lane.b32.xlu1 %v644_v35, %s2077_s29 }
  0x88   : > { %657 = vrot.lane.b32.xlu0 %v2465_v57, %s2077_s29  ;;  %v3191_v57 = vld [vmem:[#allocation16_spill] sm:$0xff] }
  0x89   : > { %669 = vrot.lane.b32.xlu1 %v2458_v27, %s2077_s29 }
  0x8c   : > { %686 = vrot.lane.b32.xlu0 %v2359_v58, %s2078_s6 }
  0x8d   : > { %698 = vrot.lane.b32.xlu1 %v2357_v51, %s2078_s6 }
  0x90   : > { %688 = vrot.lane.b32.xlu0 %v2217_v16, %s2078_s6 }
  0x91   : > { %700 = vrot.lane.b32.xlu1 %v2477_v22, %s2078_s6 }
  0x94   : > { %742 = vrot.lane.b32.xlu0 %v2511_v23, %s2079_s9 }
  0x95   : > { %754 = vrot.lane.b32.xlu1 %v2533_v13, %s2079_s9  ;;  %v488_v59 = vpop.permute.xlu1 %487 }
  0x96   : > { %v476_v62 = vpop.permute.xlu0 %475 }
  0x98   : > { %744 = vrot.lane.b32.xlu0 %v3190_v56, %s2079_s9 }
  0x99   : > { %756 = vrot.lane.b32.xlu1 %v2552_v14, %s2079_s9  ;;  %v3192_v14 = vld [vmem:[#allocation17_spill] sm:$0xff] }
  0x9a   : > { %v436_v27 = vpop.permute.xlu0 %435 }
  0x9b   : > { %v448_v2 = vpop.permute.xlu1 %447 }
  0x9c   : > { %774 = vrot.lane.b32.xlu0 %v3191_v57, %s2080_s20 }
  0x9d   : > { %786 = vrot.lane.b32.xlu1 %v2515_v61, %s2080_s20  ;;  %v3193_v61 = vld [vmem:[#allocation10_spill] sm:$0xff] }
  0x9e   : > { %v2738_v38 = vpop.permute.xlu0 %437 }
  0x9f   : > { %v2736_v13 = vpop.permute.xlu1 %449 }
  0xa0   : > { %393 = vrot.lane.b32.xlu0 %v2548_v42, %s2075_s27 }
  0xa1   : > { %405 = vrot.lane.b32.xlu1 %v2530_v63, %s2075_s27 }
  0xa2   : > { %v386_v22 = vpop.permute.xlu0 %385 }
  0xa3   : > { %v2744_v25 = vpop.permute.xlu1 %387  ;;  %v796_v19 = vsel %vm794_vm3, %v3198_v40, %v386_v22  ;;  %v3201_v22 = vld [vmem:[#allocation5_spill] sm:$0xff] }
  0xa4   : > { %776 = vrot.lane.b32.xlu0 %v3193_v61, %s2080_s20  ;;  %v798_v0 = vsel %vm794_vm3, %v3200_v55, %v2744_v25 }
  0xa5   : > { %788 = vrot.lane.b32.xlu1 %v3192_v14, %s2080_s20  ;;  %v823_v14 = vsel %vm819_vm4, %v798_v0, %v2738_v38 }
  0xa6   : > { %v398_v4 = vpop.permute.xlu0 %397 }
  0xa7   : > { %v2750_v26 = vpop.permute.xlu1 %399 }
  0xa8   : > { %395 = vrot.lane.b32.xlu0 %v2511_v23, %s2075_s27 }
  0xa9   : > { %407 = vrot.lane.b32.xlu1 %v3194_v28, %s2075_s27 }
  0xaa   : > { %v2758_v42 = vpop.permute.xlu0 %477 }
  0xab   : > { %v2756_v63 = vpop.permute.xlu1 %489 }
  0xac   : > { %443 = vrot.lane.b32.xlu0 %v420_v54, %s2074_s24 }
  0xad   : > { %455 = vrot.lane.b32.xlu1 %v432_v17, %s2074_s24  ;;  %v3197_v17 = vld [vmem:[#allocation19_spill] sm:$0xff] }
  0xae   : > { %v603_v36 = vpop.permute.xlu0 %602 }
  0xaf   : > { %v615_v30 = vpop.permute.xlu1 %614 }
  0xb0   : > { %445 = vrot.lane.b32.xlu0 %v3191_v57, %s2074_s24 }
  0xb1   : > { %457 = vrot.lane.b32.xlu1 %v3195_v24, %s2074_s24 }
  0xb2   : > { %v2768_v3 = vpop.permute.xlu0 %604 }
  0xb3   : > { %v2766_v6 = vpop.permute.xlu1 %616 }
  0xb4   : > { %483 = vrot.lane.b32.xlu0 %v2413_v21, %s2073_s21 }
  0xb5   : > { %495 = vrot.lane.b32.xlu1 %v2410_v9, %s2073_s21 }
  0xb6   : > { %v652_v33 = vpop.permute.xlu0 %651 }
  0xb7   : > { %v664_v23 = vpop.permute.xlu1 %663 }
  0xb8   : > { %485 = vrot.lane.b32.xlu0 %v3197_v17, %s2073_s21 }
  0xb9   : > { %497 = vrot.lane.b32.xlu1 %v3196_v52, %s2073_s21  ;;  %s2081_s21 = smov [#allocation2]  }
  0xba   : > { %v654_v49 = vpop.permute.xlu0 %653  ;;  %s1981_s24 = sshll.u32 %s2081_s21, 4  ;;  %s1982_s24 = int_to_ptr.vmem [resolvable:$false] %s1981_s24 }
  0xbb   : > { %v666_v1 = vpop.permute.xlu1 %665 }
  0xbc   : > { %610 = vrot.lane.b32.xlu0 %v2592_v8, %s2076_s28 }
  0xbd   : > { %622 = vrot.lane.b32.xlu1 %v2589_v11, %s2076_s28  ;;  %v808_v11 = vsel %vm794_vm3, %v2217_v16, %v398_v4 }
  0xbe   : > { %v683_v54 = vpop.permute.xlu0 %682  ;;  %v833_v29 = vsel %vm819_vm4, %v808_v11, %v448_v2 }
  0xbf   : > { %v695_v9 = vpop.permute.xlu1 %694  ;;  %v858_v16 = vsel %vm844_vm5, %v833_v29, %v488_v59 }
  0xc0   : > { %612 = vrot.lane.b32.xlu0 %v2615_v32, %s2076_s28  ;;  %v821_v32 = vsel %vm819_vm4, %v796_v19, %v436_v27  ;;  %v883_v20 = vsel %vm869_vm6, %v858_v16, %v615_v30 }
  0xc1   : > { %624 = vrot.lane.b32.xlu1 %v2623_v31, %s2076_s28  ;;  %v908_v39 = vsel %vm894_vm7, %v883_v20, %v664_v23  ;;  %s175_s28 = sand.u32 1, %s2047_s13  }
  0xc2   : > { %v685_v10 = vpop.permute.xlu0 %684  ;;  %v933_v35 = vsel %vm919_vm8, %v908_v39, %v695_v9  ;;  %v3204_v39 = vld [vmem:[#allocation7_spill] sm:$0xff]  ;;  %s3072_s11 = scalar_lea.sflag [#allocation3], %s175_s28 }
  0xc3   : > { %v697_v21 = vpop.permute.xlu1 %696 }
  0xc4   : > { %659 = vrot.lane.b32.xlu0 %v2603_v47, %s2077_s29 }
  0xc5   : > { %671 = vrot.lane.b32.xlu1 %v2598_v50, %s2077_s29  ;;  %v846_v50 = vsel %vm844_vm5, %v821_v32, %v476_v62 }
  0xc6   : > { %v739_v31 = vpop.permute.xlu0 %738  ;;  %v871_v37 = vsel %vm869_vm6, %v846_v50, %v603_v36 }
  0xc7   : > { %v751_v8 = vpop.permute.xlu1 %750 }
  0xc8   : > { %661 = vrot.lane.b32.xlu0 %v2620_v7, %s2077_s29  ;;  %v3199_v7 = vld [vmem:[#allocation6_spill] sm:$0xff]  ;;  %v958_v62 = vsel %vm944_vm9, %v933_v35, %v751_v8 }
  0xc9   : > { %673 = vrot.lane.b32.xlu1 %v2606_v15, %s2077_s29  ;;  %v896_v15 = vsel %vm894_vm7, %v871_v37, %v652_v33  ;;  %v810_v59 = vsel %vm794_vm3, %v3199_v7, %v2750_v26  ;;  %v848_v26 = vsel %vm844_vm5, %v823_v14, %v2758_v42  ;;  %s1765_s29 = smul.u32 96, %s175_s28 }
  0xca   : > { %v741_v60 = vpop.permute.xlu0 %740  ;;  %v921_v48 = vsel %vm919_vm8, %v896_v15, %v683_v54  ;;  %v835_v25 = vsel %vm819_vm4, %v810_v59, %v2736_v13  ;;  %v873_v13 = vsel %vm869_vm6, %v848_v26, %v2768_v3 }
  0xcb   : > { %v753_v47 = vpop.permute.xlu1 %752  ;;  %v860_v61 = vsel %vm844_vm5, %v835_v25, %v2756_v63  ;;  %v898_v30 = vsel %vm894_vm7, %v873_v13, %v654_v49  ;;  %v3202_v63 = vld [vmem:[#allocation13_spill] sm:$0xff]  ;;  %v3206_v13 = vld [vmem:[#allocation15_spill] sm:$0xff]  ;;  %s2986_s4 = scalar_lea.vmem [#allocation2], %s1765_s29  ;;  %s1983_s29 = scalar_lea.vmem %s1982_s24, 3072 }
  0xcc   : > { %690 = vrot.lane.b32.xlu0 %v3199_v7, %s2078_s6  ;;  %v885_v28 = vsel %vm869_vm6, %v860_v61, %v2766_v6  ;;  %v923_v36 = vsel %vm919_vm8, %v898_v30, %v685_v10  ;;  %s1459_s15 = sshll.u32 %s2986_s4, 4  ;;  %s3060_s15 = int_to_ptr.vmem [resolvable:$true] %s1459_s15 }
  0xcd   : > { %702 = vrot.lane.b32.xlu1 %v2484_v53, %s2078_s6  ;;  %v946_v53 = vsel %vm944_vm9, %v921_v48, %v739_v31  ;;  %v910_v38 = vsel %vm894_vm7, %v885_v28, %v666_v1  ;;  %v948_v6 = vsel %vm944_vm9, %v923_v36, %v741_v60  ;;  %v3203_v1 = vld [vmem:[#allocation11_spill] sm:$0xff]  ;;  %p1984_p2 = scmp.lt.s32.totalorder %s3060_s15, %s1982_s24 }
  0xce   : > { %v771_v2 = vpop.permute.xlu0 %770  ;;  %v935_v42 = vsel %vm919_vm8, %v910_v38, %v697_v21 }
  0xcf   : > { %v783_v56 = vpop.permute.xlu1 %782  ;;  %v971_v27 = vsel %vm969_vm10, %v946_v53, %v771_v2  ;;  %v960_v24 = vsel %vm944_vm9, %v935_v42, %v753_v47 }
  0xd0   : > { %v983_v57 = vsel %vm969_vm10, %v958_v62, %v783_v56  ;;  %692 = vrot.lane.b32.xlu0 %v3201_v22, %s2078_s6  ;;  %1733 = vmatprep.mubr.msk.bf16.mxu0 %vm1021_vm11, %v971_v27 }
  0xd1   : > { %704 = vrot.lane.b32.xlu1 %v2583_v5, %s2078_s6  ;;  %1745 = vmatprep.mubr.msk.bf16.mxu1 %vm1021_vm11, %v983_v57  ;;  %s1767_s6 = smul.u32 48, %s2059_s16 }
  0xd2   : > { %v390_v4 = vpop.permute.xlu0 %389 }
  0xd3   : > { %v402_v5 = vpop.permute.xlu1 %401  ;;  %v800_v15 = vsel %vm794_vm3, %v3204_v39, %v390_v4  ;;  %v3205_v4 = vld [vmem:[#allocation12_spill] sm:$0xff]  ;;  %s1456_s7 = sadd.s32 %s1767_s6, %s1451_s5 }
  0xd4   : > { %746 = vrot.lane.b32.xlu0 %v3202_v63, %s2079_s9  ;;  %v812_v37 = vsel %vm794_vm3, %v3201_v22, %v402_v5  ;;  %s1614_s16 = sshll.u32 %s1456_s7, 6 }
  0xd5   : > { %758 = vrot.lane.b32.xlu1 %v2645_v18, %s2079_s9  ;;  %s3066_s10 = scalar_lea.hbm %s3128_s3, %s1614_s16 }
  0xd6   : > { %v773_v3 = vpop.permute.xlu0 %772 }
  0xd7   : > { %v785_v23 = vpop.permute.xlu1 %784  ;;  %v973_v52 = vsel %vm969_vm10, %v948_v6, %v773_v3 }
  0xd8   : > { %v985_v33 = vsel %vm969_vm10, %v960_v24, %v785_v23  ;;  %748 = vrot.lane.b32.xlu0 %v2640_v12, %s2079_s9  ;;  %1734 = vmatmul.mubr.msk.bf16.vlgmr.msra.gmra.mrb[0].mxu0 %vm1021_vm11, %v973_v52 }
  0xd9   : > { %760 = vrot.lane.b32.xlu1 %v2648_v43, %s2079_s9  ;;  %1746 = vmatmul.mubr.msk.bf16.vlgmr.msra.gmra.mrb[0].mxu1 %vm1021_vm11, %v985_v33 }
  0xda   : > { %v392_v17 = vpop.permute.xlu0 %391 }
  0xdb   : > { %v404_v18 = vpop.permute.xlu1 %403  ;;  %v802_v38 = vsel %vm794_vm3, %v3206_v13, %v392_v17 }
  0xdc   : > { %778 = vrot.lane.b32.xlu0 %v3203_v1, %s2080_s20  ;;  %v814_v28 = vsel %vm794_vm3, %v3205_v4, %v404_v18 }
  0xdd   : > { %790 = vrot.lane.b32.xlu1 %v2636_v44, %s2080_s20 }
  0xde   : > { %v440_v9 = vpop.permute.xlu0 %439 }
  0xdf   : > { %v452_v49 = vpop.permute.xlu1 %451  ;;  %v825_v35 = vsel %vm819_vm4, %v800_v15, %v440_v9 }
  0xe0   : > { %780 = vrot.lane.b32.xlu0 %v2379_v45, %s2080_s20  ;;  %v837_v7 = vsel %vm819_vm4, %v812_v37, %v452_v49 }
  0xe1   : > { %792 = vrot.lane.b32.xlu1 %v2654_v46, %s2080_s20  ;;  %s1977_s20 = scalar_lea.vmem %s3060_s15, 1536 }
  0xe2   : > { %v442_v43 = vpop.permute.xlu0 %441  ;;  %p1978_p13 = scmp.ne.s32.totalorder %s3060_s15, %s1977_s20  ;;  %p1985_p4 = scmp.lt.s32.totalorder %s1983_s29, %s1977_s20 }
  0xe3   : > { %v454_v12 = vpop.permute.xlu1 %453  ;;  %v827_v63 = vsel %vm819_vm4, %v802_v38, %v442_v43 }
  0xe4   : > { %v839_v30 = vsel %vm819_vm4, %v814_v28, %v454_v12  ;;  %p1979_p0 = pnand %p1978_p13, %p2154_p3  ;;  %p1986_p5 = por %p1985_p4, %p1984_p2 }
  0xe6   : > { %v480_v21 = vpop.permute.xlu0 %479  ;;  %p1980_p1 = pneg %p1979_p0 }
  0xe7   : > { %v492_v54 = vpop.permute.xlu1 %491  ;;  %v850_v55 = vsel %vm844_vm5, %v825_v35, %v480_v21 }
  0xe8   : > { %v862_v48 = vsel %vm844_vm5, %v837_v7, %v492_v54  ;;  %p1987_p6 = pnand %p1986_p5, %p1980_p1 }
  0xea   : > { %v482_v40 = vpop.permute.xlu0 %481 }
  0xeb   : > { %v494_v10 = vpop.permute.xlu1 %493  ;;  %v852_v36 = vsel %vm844_vm5, %v827_v63, %v482_v40 }
  0xec   : > { %v864_v42 = vsel %vm844_vm5, %v839_v30, %v494_v10 }
  0xee   : > { %v607_v11 = vpop.permute.xlu0 %606 }
  0xef   : > { %v619_v19 = vpop.permute.xlu1 %618  ;;  %v875_v53 = vsel %vm869_vm6, %v850_v55, %v607_v11 }
  0xf0   : > { %v887_v62 = vsel %vm869_vm6, %v862_v48, %v619_v19 }
  0xf2   : > { %v609_v8 = vpop.permute.xlu0 %608 }
  0xf3   : > { %v621_v44 = vpop.permute.xlu1 %620  ;;  %v877_v3 = vsel %vm869_vm6, %v852_v36, %v609_v8 }
  0xf4   : > { %v889_v23 = vsel %vm869_vm6, %v864_v42, %v621_v44 }
  0xf6   : > { %v656_v32 = vpop.permute.xlu0 %655 }
  0xf7   : > { %v668_v31 = vpop.permute.xlu1 %667  ;;  %v900_v2 = vsel %vm894_vm7, %v875_v53, %v656_v32 }
  0xf8   : > { %v912_v56 = vsel %vm894_vm7, %v887_v62, %v668_v31 }
  0xfa   : > { %v658_v16 = vpop.permute.xlu0 %657 }
  0xfb   : > { %v670_v29 = vpop.permute.xlu1 %669  ;;  %v902_v52 = vsel %vm894_vm7, %v877_v3, %v658_v16 }
  0xfc   : > { %v914_v33 = vsel %vm894_vm7, %v889_v23, %v670_v29 }
  0xfe   : > { %v687_v47 = vpop.permute.xlu0 %686 }
  0xff   : > { %v699_v50 = vpop.permute.xlu1 %698  ;;  %v925_v57 = vsel %vm919_vm8, %v900_v2, %v687_v47 }
 0x100   : > { %v937_v27 = vsel %vm919_vm8, %v912_v56, %v699_v50 }
 0x102   : > { %v689_v60 = vpop.permute.xlu0 %688 }
 0x103   : > { %v701_v46 = vpop.permute.xlu1 %700  ;;  %v927_v17 = vsel %vm919_vm8, %v902_v52, %v689_v60 }
 0x104   : > { %v939_v18 = vsel %vm919_vm8, %v914_v33, %v701_v46 }
 0x106   : > { %v743_v45 = vpop.permute.xlu0 %742 }
 0x107   : > { %v755_v20 = vpop.permute.xlu1 %754  ;;  %v950_v25 = vsel %vm944_vm9, %v925_v57, %v743_v45 }
 0x108   : > { %v962_v22 = vsel %vm944_vm9, %v937_v27, %v755_v20 }
 0x10a   : > { %v745_v59 = vpop.permute.xlu0 %744 }
 0x10b   : > { %v757_v0 = vpop.permute.xlu1 %756  ;;  %v952_v49 = vsel %vm944_vm9, %v927_v17, %v745_v59 }
 0x10c   : > { %v964_v1 = vsel %vm944_vm9, %v939_v18, %v757_v0 }
 0x10e   : > { %v775_v61 = vpop.permute.xlu0 %774 }
 0x10f   : > { %v787_v14 = vpop.permute.xlu1 %786  ;;  %v975_v5 = vsel %vm969_vm10, %v950_v25, %v775_v61 }
 0x110   : > { %v987_v26 = vsel %vm969_vm10, %v962_v22, %v787_v14  ;;  %1737 = vmatprep.mubr.msk.bf16.mxu0 %vm1021_vm11, %v975_v5 }
 0x111   : > { %1749 = vmatprep.mubr.msk.bf16.mxu1 %vm1021_vm11, %v987_v26 }
 0x112   : > { %v394_v6 = vpop.permute.xlu0 %393 }
 0x113   : > { %v406_v24 = vpop.permute.xlu1 %405  ;;  %v804_v59 = vsel %vm794_vm3, %v2324_v41, %v394_v6 }
 0x114   : > { %v816_v0 = vsel %vm794_vm3, %v2317_v34, %v406_v24 }
 0x116   : > { %v777_v12 = vpop.permute.xlu0 %776 }
 0x117   : > { %v789_v9 = vpop.permute.xlu1 %788  ;;  %v977_v54 = vsel %vm969_vm10, %v952_v49, %v777_v12 }
 0x118   : > { %v989_v43 = vsel %vm969_vm10, %v964_v1, %v789_v9  ;;  %1738 = vmatmul.mubr.msk.bf16.gmra.mrb[4].mxu0 %vm1021_vm11, %v977_v54 }
 0x119   : > { %1750 = vmatmul.mubr.msk.bf16.gmra.mrb[4].mxu1 %vm1021_vm11, %v989_v43  ;;  %v2949_v43 = vld [vmem:[%s3127_s2] ss:$0 sm:$0xff] }
 0x11a   : > { %v396_v10 = vpop.permute.xlu0 %395 }
 0x11b   : > { %v408_v21 = vpop.permute.xlu1 %407  ;;  %v806_v41 = vsel %vm794_vm3, %v2359_v58, %v396_v10 }
 0x11c   : > { %v818_v34 = vsel %vm794_vm3, %v2357_v51, %v408_v21 }
 0x11e   : > { %v444_v19 = vpop.permute.xlu0 %443 }
 0x11f   : > { %v456_v40 = vpop.permute.xlu1 %455  ;;  %v829_v53 = vsel %vm819_vm4, %v804_v59, %v444_v19 }
 0x120   : > { %v841_v62 = vsel %vm819_vm4, %v816_v0, %v456_v40 }
 0x122   : > { %v446_v44 = vpop.permute.xlu0 %445 }
 0x123   : > { %v458_v11 = vpop.permute.xlu1 %457  ;;  %v831_v5 = vsel %vm819_vm4, %v806_v41, %v446_v44 }
 0x124   : > { %v843_v26 = vsel %vm819_vm4, %v818_v34, %v458_v11 }
 0x126   : > { %v484_v31 = vpop.permute.xlu0 %483 }
 0x127   : > { %v496_v8 = vpop.permute.xlu1 %495  ;;  %v854_v2 = vsel %vm844_vm5, %v829_v53, %v484_v31 }
 0x128   : > { %v866_v56 = vsel %vm844_vm5, %v841_v62, %v496_v8 }
 0x12a   : > { %v486_v29 = vpop.permute.xlu0 %485 }
 0x12b   : > { %v498_v32 = vpop.permute.xlu1 %497  ;;  %v856_v38 = vsel %vm844_vm5, %v831_v5, %v486_v29 }
 0x12c   : > { %v868_v13 = vsel %vm844_vm5, %v843_v26, %v498_v32 }
 0x12e   : > { %v611_v50 = vpop.permute.xlu0 %610 }
 0x12f   : > { %v623_v16 = vpop.permute.xlu1 %622  ;;  %v879_v25 = vsel %vm869_vm6, %v854_v2, %v611_v50 }
 0x130   : > { %v891_v22 = vsel %vm869_vm6, %v866_v56, %v623_v16 }
 0x132   : > { %v613_v46 = vpop.permute.xlu0 %612 }
 0x133   : > { %v625_v47 = vpop.permute.xlu1 %624  ;;  %v881_v36 = vsel %vm869_vm6, %v856_v38, %v613_v46 }
 0x134   : > { %v893_v42 = vsel %vm869_vm6, %v868_v13, %v625_v47 }
 0x136   : > { %v660_v20 = vpop.permute.xlu0 %659 }
 0x137   : > { %v672_v60 = vpop.permute.xlu1 %671  ;;  %v904_v61 = vsel %vm894_vm7, %v879_v25, %v660_v20 }
 0x138   : > { %v916_v14 = vsel %vm894_vm7, %v891_v22, %v672_v60 }
 0x13a   : > { %v662_v37 = vpop.permute.xlu0 %661 }
 0x13b   : > { %v674_v45 = vpop.permute.xlu1 %673  ;;  %v906_v3 = vsel %vm894_vm7, %v881_v36, %v662_v37 }
 0x13c   : > { %v918_v23 = vsel %vm894_vm7, %v893_v42, %v674_v45 }
 0x13e   : > { %v691_v15 = vpop.permute.xlu0 %690 }
 0x13f   : > { %v703_v39 = vpop.permute.xlu1 %702  ;;  %v929_v28 = vsel %vm919_vm8, %v904_v61, %v691_v15 }
 0x140   : > { %v941_v4 = vsel %vm919_vm8, %v916_v14, %v703_v39 }
 0x142   : > { %v693_v35 = vpop.permute.xlu0 %692 }
 0x143   : > { %v705_v7 = vpop.permute.xlu1 %704  ;;  %v931_v52 = vsel %vm919_vm8, %v906_v3, %v693_v35 }
 0x144   : > { %v943_v33 = vsel %vm919_vm8, %v918_v23, %v705_v7 }
 0x146   : > { %v747_v55 = vpop.permute.xlu0 %746 }
 0x147   : > { %v759_v48 = vpop.permute.xlu1 %758  ;;  %v954_v58 = vsel %vm944_vm9, %v929_v28, %v747_v55 }
 0x148   : > { %v966_v51 = vsel %vm944_vm9, %v941_v4, %v759_v48 }
 0x14a   : > { %v749_v57 = vpop.permute.xlu0 %748 }
 0x14b   : > { %v761_v27 = vpop.permute.xlu1 %760  ;;  %v956_v17 = vsel %vm944_vm9, %v931_v52, %v749_v57 }
 0x14c   : > { %v968_v18 = vsel %vm944_vm9, %v943_v33, %v761_v27 }
 0x14e   : > { %v779_v63 = vpop.permute.xlu0 %778 }
 0x14f   : > { %v791_v30 = vpop.permute.xlu1 %790  ;;  %v979_v6 = vsel %vm969_vm10, %v954_v58, %v779_v63 }
 0x150   : > { %v991_v24 = vsel %vm969_vm10, %v966_v51, %v791_v30  ;;  %1741 = vmatprep.mubr.msk.bf16.mxu0 %vm1021_vm11, %v979_v6 }
 0x151   : > { %1753 = vmatprep.mubr.msk.bf16.mxu1 %vm1021_vm11, %v991_v24 }
 0x152   : > { %v781_v49 = vpop.permute.xlu0 %780 }
 0x153   : > { %v793_v1 = vpop.permute.xlu1 %792  ;;  %v981_v12 = vsel %vm969_vm10, %v956_v17, %v781_v49 }
 0x154   : > { %v993_v9 = vsel %vm969_vm10, %v968_v18, %v793_v1  ;;  %1742 = vmatmul.mubr.msk.bf16.gmra.mrb[8].mxu0 %vm1021_vm11, %v981_v12 }
 0x155   : > { %1754 = vmatmul.mubr.msk.bf16.gmra.mrb[8].mxu1 %vm1021_vm11, %v993_v9 }
 0x1ab   : > { %v1735_v54 = vpop.f32.mrb[0].mxu0 }
 0x1ac   : > { %v1747_v21 = vpop.f32.mrb[0].mxu1  ;;  %v2952_v10 = vadd.f32 %v1735_v54, %v2949_v43  ;;  %v1084_v19 = vpop.f32.mrb[1].mxu0 }
 0x1ad   : > { %v2955_v40 = vadd.f32 %v1747_v21, %v2949_v43  ;;  %v1132_v11 = vpop.f32.mrb[1].mxu1  ;;  %v2958_v44 = vadd.f32 %v2949_v43, %v1084_v19  ;;  %v1736_v31 = vpop.f32.mrb[2].mxu0 }
 0x1ae   : > { %v2961_v8 = vadd.f32 %v2949_v43, %v1132_v11  ;;  %v1748_v32 = vpop.f32.mrb[2].mxu1  ;;  %v1181_v29 = vsub.f32 0.0, %v2952_v10  ;;  %v1096_v50 = vadd.f32 %v1736_v31, %v2949_v43  ;;  %v1087_v46 = vpop.f32.mrb[3].mxu0 }
 0x1af   : > { %v1193_v16 = vsub.f32 0.0, %v2955_v40  ;;  %v2967_v47 = vadd.f32 %v1748_v32, %v2949_v43  ;;  %v1135_v60 = vpop.f32.mrb[3].mxu1  ;;  %v1179_v20 = vsub.f32 0.0, %v2958_v44  ;;  %v1088_v37 = vadd.f32 %v2949_v43, %v1087_v46 }
 0x1b0   : > { %v1191_v45 = vsub.f32 0.0, %v2961_v8  ;;  %v2973_v39 = vadd.f32 %v2949_v43, %v1135_v60  ;;  %v1207_v15 = vmul.f32 1.442695, %v1181_v29  ;;  %v1182_v35 = vsub.f32 0.0, %v1096_v50 }
 0x1b1   : > { %v1231_v7 = vmul.f32 1.442695, %v1193_v16  ;;  %v1194_v48 = vsub.f32 0.0, %v2967_v47  ;;  %v1203_v55 = vmul.f32 1.442695, %v1179_v20  ;;  %v1180_v59 = vsub.f32 0.0, %v1088_v37 }
 0x1b2   : > { %v1227_v0 = vmul.f32 1.442695, %v1191_v45  ;;  %v1192_v62 = vsub.f32 0.0, %v2973_v39  ;;  %1881 = vpow2.f32 %v1207_v15  ;;  %v1209_v53 = vmul.f32 1.442695, %v1182_v35 }
 0x1b3   : > { %1883 = vpow2.f32 %v1231_v7  ;;  %v1233_v56 = vmul.f32 1.442695, %v1194_v48  ;;  %v1205_v2 = vmul.f32 1.442695, %v1180_v59 }
 0x1b4   : > { %1885 = vpow2.f32 %v1203_v55  ;;  %v1229_v27 = vmul.f32 1.442695, %v1192_v62 }
 0x1b5   : > { %1887 = vpow2.f32 %v1227_v0 }
 0x1b6   : > { %1889 = vpow2.f32 %v1209_v53 }
 0x1b7   : > { %1891 = vpow2.f32 %v1233_v56 }
 0x1b8   : > { %1893 = vpow2.f32 %v1205_v2 }
 0x1b9   : > { %1895 = vpow2.f32 %v1229_v27 }
 0x1bc   : > { %v1882_v57 = vpop.eup %1881 }
 0x1bd   : > { %v1884_v22 = vpop.eup %1883  ;;  %v1253_v25 = vadd.f32 1.0, %v1882_v57 }
 0x1be   : > { %v1886_v34 = vpop.eup %1885  ;;  %v1265_v41 = vadd.f32 1.0, %v1884_v22 }
 0x1bf   : > { %v1888_v14 = vpop.eup %1887  ;;  %1897 = vrcp.f32 %v1253_v25  ;;  %v1251_v61 = vadd.f32 1.0, %v1886_v34 }
 0x1c0   : > { %v1890_v26 = vpop.eup %1889  ;;  %1899 = vrcp.f32 %v1265_v41  ;;  %v1263_v5 = vadd.f32 1.0, %v1888_v14 }
 0x1c1   : > { %v1892_v4 = vpop.eup %1891  ;;  %1901 = vrcp.f32 %v1251_v61  ;;  %v1254_v28 = vadd.f32 1.0, %v1890_v26 }
 0x1c2   : > { %v1894_v13 = vpop.eup %1893  ;;  %1903 = vrcp.f32 %v1263_v5  ;;  %v1266_v38 = vadd.f32 1.0, %v1892_v4 }
 0x1c3   : > { %v1896_v51 = vpop.eup %1895  ;;  %1905 = vrcp.f32 %v1254_v28  ;;  %v1252_v58 = vadd.f32 1.0, %v1894_v13 }
 0x1c4   : > { %1907 = vrcp.f32 %v1266_v38  ;;  %v1264_v30 = vadd.f32 1.0, %v1896_v51 }
 0x1c5   : > { %1909 = vrcp.f32 %v1252_v58 }
 0x1c6   : > { %1911 = vrcp.f32 %v1264_v30 }
 0x1c9   : > { %v1898_v63 = vpop.eup %1897 }
 0x1ca   : > { %v1900_v42 = vpop.eup %1899  ;;  %v1301_v3 = vmul.f32 %v1898_v63, %v2952_v10 }
 0x1cb   : > { %v1902_v36 = vpop.eup %1901  ;;  %v1313_v18 = vmul.f32 %v1900_v42, %v2955_v40 }
 0x1cc   : > { %v1904_v24 = vpop.eup %1903  ;;  %v1299_v49 = vmul.f32 %v1902_v36, %v2958_v44 }
 0x1cd   : > { %v1906_v6 = vpop.eup %1905  ;;  %v1311_v54 = vmul.f32 %v1904_v24, %v2961_v8 }
 0x1ce   : > { %v1908_v23 = vpop.eup %1907  ;;  %v1302_v33 = vmul.f32 %v1906_v6, %v1096_v50 }
 0x1cf   : > { %v1910_v52 = vpop.eup %1909  ;;  %v1314_v17 = vmul.f32 %v1908_v23, %v2967_v47 }
 0x1d0   : > { %v1912_v1 = vpop.eup %1911  ;;  %v1649_v9 = vpack.c.bf16 %v1302_v33, %v1301_v3  ;;  %v1300_v12 = vmul.f32 %v1910_v52, %v1088_v37 }
 0x1d1   : > { %v1679_v21 = vpack.c.bf16 %v1314_v17, %v1313_v18  ;;  %v1312_v19 = vmul.f32 %v1912_v1, %v2973_v39 }
 0x1d2   : > { %1701 = vst [vmem:[%s2986_s4 + $0x8] sm:$0xff] %v1649_v9   ;;  %v1644_v10 = vpack.c.bf16 %v1300_v12, %v1299_v49 }
 0x1d3   : > { %1707 = vst [vmem:[%s2986_s4 + $0x38] sm:$0xff] %v1679_v21   ;;  %v1674_v40 = vpack.c.bf16 %v1312_v19, %v1311_v54 }
 0x1d4   : > { %1645 = vst [vmem:[%s2986_s4] sm:$0xff] %v1644_v10  }
 0x1d5   : > { %1706 = vst [vmem:[%s2986_s4 + $0x30] sm:$0xff] %v1674_v40  }
 0x1eb   : > { %v1739_v11 = vpop.f32.mrb[4].mxu0 }
 0x1ec   : > { %v1751_v44 = vpop.f32.mrb[4].mxu1  ;;  %v2993_v31 = vadd.f32 %v1739_v11, %v2949_v43  ;;  %v1100_v32 = vpop.f32.mrb[5].mxu0 }
 0x1ed   : > { %v2996_v8 = vadd.f32 %v1751_v44, %v2949_v43  ;;  %v1148_v29 = vpop.f32.mrb[5].mxu1  ;;  %v2999_v16 = vadd.f32 %v2949_v43, %v1100_v32  ;;  %v1740_v47 = vpop.f32.mrb[6].mxu0 }
 0x1ee   : > { %v3002_v50 = vadd.f32 %v2949_v43, %v1148_v29  ;;  %v1752_v46 = vpop.f32.mrb[6].mxu1  ;;  %v1185_v60 = vsub.f32 0.0, %v2993_v31  ;;  %v1112_v45 = vadd.f32 %v1740_v47, %v2949_v43  ;;  %v1103_v39 = vpop.f32.mrb[7].mxu0 }
 0x1ef   : > { %v1197_v20 = vsub.f32 0.0, %v2996_v8  ;;  %v1160_v37 = vadd.f32 %v1752_v46, %v2949_v43  ;;  %v1151_v15 = vpop.f32.mrb[7].mxu1  ;;  %v1183_v7 = vsub.f32 0.0, %v2999_v16  ;;  %v1104_v48 = vadd.f32 %v2949_v43, %v1103_v39 }
 0x1f0   : > { %v1195_v35 = vsub.f32 0.0, %v3002_v50  ;;  %v1152_v55 = vadd.f32 %v2949_v43, %v1151_v15  ;;  %v1215_v0 = vmul.f32 1.442695, %v1185_v60  ;;  %v1186_v62 = vsub.f32 0.0, %v1112_v45 }
 0x1f1   : > { %v1239_v59 = vmul.f32 1.442695, %v1197_v20  ;;  %v1198_v53 = vsub.f32 0.0, %v1160_v37  ;;  %v1211_v56 = vmul.f32 1.442695, %v1183_v7  ;;  %v1184_v27 = vsub.f32 0.0, %v1104_v48 }
 0x1f2   : > { %v1235_v2 = vmul.f32 1.442695, %v1195_v35  ;;  %v1196_v57 = vsub.f32 0.0, %v1152_v55  ;;  %1913 = vpow2.f32 %v1215_v0  ;;  %v1217_v22 = vmul.f32 1.442695, %v1186_v62 }
 0x1f3   : > { %1915 = vpow2.f32 %v1239_v59  ;;  %v1241_v25 = vmul.f32 1.442695, %v1198_v53  ;;  %v1213_v34 = vmul.f32 1.442695, %v1184_v27 }
 0x1f4   : > { %1917 = vpow2.f32 %v1211_v56  ;;  %v1237_v41 = vmul.f32 1.442695, %v1196_v57 }
 0x1f5   : > { %1919 = vpow2.f32 %v1235_v2 }
 0x1f6   : > { %1921 = vpow2.f32 %v1217_v22 }
 0x1f7   : > { %1923 = vpow2.f32 %v1241_v25 }
 0x1f8   : > { %1925 = vpow2.f32 %v1213_v34 }
 0x1f9   : > { %1927 = vpow2.f32 %v1237_v41 }
 0x1fc   : > { %v1914_v14 = vpop.eup %1913 }
 0x1fd   : > { %v1916_v61 = vpop.eup %1915  ;;  %v1257_v26 = vadd.f32 1.0, %v1914_v14 }
 0x1fe   : > { %v1918_v5 = vpop.eup %1917  ;;  %v1269_v4 = vadd.f32 1.0, %v1916_v61 }
 0x1ff   : > { %v1920_v28 = vpop.eup %1919  ;;  %1929 = vrcp.f32 %v1257_v26  ;;  %v1255_v13 = vadd.f32 1.0, %v1918_v5 }
 0x200   : > { %v1922_v38 = vpop.eup %1921  ;;  %1931 = vrcp.f32 %v1269_v4  ;;  %v1267_v51 = vadd.f32 1.0, %v1920_v28 }
 0x201   : > { %v1924_v58 = vpop.eup %1923  ;;  %1933 = vrcp.f32 %v1255_v13  ;;  %v1258_v30 = vadd.f32 1.0, %v1922_v38 }
 0x202   : > { %v1926_v63 = vpop.eup %1925  ;;  %1935 = vrcp.f32 %v1267_v51  ;;  %v1270_v42 = vadd.f32 1.0, %v1924_v58 }
 0x203   : > { %v1928_v36 = vpop.eup %1927  ;;  %1937 = vrcp.f32 %v1258_v30  ;;  %v1256_v24 = vadd.f32 1.0, %v1926_v63 }
 0x204   : > { %1939 = vrcp.f32 %v1270_v42  ;;  %v1268_v6 = vadd.f32 1.0, %v1928_v36 }
 0x205   : > { %1941 = vrcp.f32 %v1256_v24 }
 0x206   : > { %1943 = vrcp.f32 %v1268_v6 }
 0x209   : > { %v1930_v23 = vpop.eup %1929 }
 0x20a   : > { %v1932_v3 = vpop.eup %1931  ;;  %v1305_v1 = vmul.f32 %v1930_v23, %v2993_v31 }
 0x20b   : > { %v1934_v33 = vpop.eup %1933  ;;  %v1317_v12 = vmul.f32 %v1932_v3, %v2996_v8 }
 0x20c   : > { %v1936_v52 = vpop.eup %1935  ;;  %v1303_v19 = vmul.f32 %v1934_v33, %v2999_v16 }
 0x20d   : > { %v1938_v18 = vpop.eup %1937  ;;  %v1315_v11 = vmul.f32 %v1936_v52, %v3002_v50 }
 0x20e   : > { %v1940_v17 = vpop.eup %1939  ;;  %v1306_v49 = vmul.f32 %v1938_v18, %v1112_v45 }
 0x20f   : > { %v1942_v9 = vpop.eup %1941  ;;  %v1318_v54 = vmul.f32 %v1940_v17, %v1160_v37 }
 0x210   : > { %v1944_v21 = vpop.eup %1943  ;;  %v1659_v10 = vpack.c.bf16 %v1306_v49, %v1305_v1  ;;  %v1304_v40 = vmul.f32 %v1942_v9, %v1104_v48 }
 0x211   : > { %v1689_v44 = vpack.c.bf16 %v1318_v54, %v1317_v12  ;;  %v1316_v32 = vmul.f32 %v1944_v21, %v1152_v55 }
 0x212   : > { %1703 = vst [vmem:[%s2986_s4 + $0x18] sm:$0xff] %v1659_v10   ;;  %v1654_v29 = vpack.c.bf16 %v1304_v40, %v1303_v19 }
 0x213   : > { %1709 = vst [vmem:[%s2986_s4 + $0x48] sm:$0xff] %v1689_v44   ;;  %v1684_v31 = vpack.c.bf16 %v1316_v32, %v1315_v11 }
 0x214   : > { %1702 = vst [vmem:[%s2986_s4 + $0x10] sm:$0xff] %v1654_v29  }
 0x215   : > { %1708 = vst [vmem:[%s2986_s4 + $0x40] sm:$0xff] %v1684_v31  }
 0x227   : > { %v1743_v47 = vpop.f32.mrb[8].mxu0 }
 0x228   : > { %v1755_v46 = vpop.f32.mrb[8].mxu1  ;;  %v3021_v8 = vadd.f32 %v1743_v47, %v2949_v43  ;;  %v1116_v16 = vpop.f32.mrb[9].mxu0 }
 0x229   : > { %v3024_v60 = vadd.f32 %v1755_v46, %v2949_v43  ;;  %v1164_v20 = vpop.f32.mrb[9].mxu1  ;;  %v3027_v50 = vadd.f32 %v2949_v43, %v1116_v16  ;;  %v1744_v37 = vpop.f32.mrb[10].mxu0 }
 0x22a   : > { %v3030_v45 = vadd.f32 %v2949_v43, %v1164_v20  ;;  %v1756_v39 = vpop.f32.mrb[10].mxu1  ;;  %v1189_v15 = vsub.f32 0.0, %v3021_v8  ;;  %v1128_v35 = vadd.f32 %v1744_v37, %v2949_v43  ;;  %v1119_v55 = vpop.f32.mrb[11].mxu0 }
 0x22b   : > { %v1201_v7 = vsub.f32 0.0, %v3024_v60  ;;  %v3036_v48 = vadd.f32 %v1756_v39, %v2949_v43  ;;  %v1167_v0 = vpop.f32.mrb[11].mxu1  ;;  %v1187_v59 = vsub.f32 0.0, %v3027_v50  ;;  %v3041_v53 = vadd.f32 %v2949_v43, %v1119_v55 }
 0x22c   : > { %v1199_v62 = vsub.f32 0.0, %v3030_v45  ;;  %v3044_v56 = vadd.f32 %v2949_v43, %v1167_v0  ;;  %v1223_v2 = vmul.f32 1.442695, %v1189_v15  ;;  %v1190_v57 = vsub.f32 0.0, %v1128_v35 }
 0x22d   : > { %v1247_v27 = vmul.f32 1.442695, %v1201_v7  ;;  %v1202_v22 = vsub.f32 0.0, %v3036_v48  ;;  %v1219_v25 = vmul.f32 1.442695, %v1187_v59  ;;  %v1188_v41 = vsub.f32 0.0, %v3041_v53 }
 0x22e   : > { %v1243_v34 = vmul.f32 1.442695, %v1199_v62  ;;  %v1200_v14 = vsub.f32 0.0, %v3044_v56  ;;  %1945 = vpow2.f32 %v1223_v2  ;;  %v1225_v61 = vmul.f32 1.442695, %v1190_v57 }
 0x22f   : > { %1947 = vpow2.f32 %v1247_v27  ;;  %v1249_v26 = vmul.f32 1.442695, %v1202_v22  ;;  %v1221_v5 = vmul.f32 1.442695, %v1188_v41 }
 0x230   : > { %1949 = vpow2.f32 %v1219_v25  ;;  %v1245_v43 = vmul.f32 1.442695, %v1200_v14 }
 0x231   : > { %1951 = vpow2.f32 %v1243_v34 }
 0x232   : > { %1953 = vpow2.f32 %v1225_v61 }
 0x233   : > { %1955 = vpow2.f32 %v1249_v26 }
 0x234   : > { %1957 = vpow2.f32 %v1221_v5 }
 0x235   : > { %1959 = vpow2.f32 %v1245_v43 }
 0x238   : > { %v1946_v4 = vpop.eup %1945 }
 0x239   : > { %v1948_v28 = vpop.eup %1947  ;;  %v1261_v13 = vadd.f32 1.0, %v1946_v4 }
 0x23a   : > { %v1950_v38 = vpop.eup %1949  ;;  %v1273_v51 = vadd.f32 1.0, %v1948_v28 }
 0x23b   : > { %v1952_v58 = vpop.eup %1951  ;;  %1961 = vrcp.f32 %v1261_v13  ;;  %v1259_v30 = vadd.f32 1.0, %v1950_v38 }
 0x23c   : > { %v1954_v63 = vpop.eup %1953  ;;  %1963 = vrcp.f32 %v1273_v51  ;;  %v1271_v42 = vadd.f32 1.0, %v1952_v58 }
 0x23d   : > { %v1956_v36 = vpop.eup %1955  ;;  %1965 = vrcp.f32 %v1259_v30  ;;  %v1262_v24 = vadd.f32 1.0, %v1954_v63 }
 0x23e   : > { %v1958_v6 = vpop.eup %1957  ;;  %1967 = vrcp.f32 %v1271_v42  ;;  %v1274_v23 = vadd.f32 1.0, %v1956_v36 }
 0x23f   : > { %v1960_v3 = vpop.eup %1959  ;;  %1969 = vrcp.f32 %v1262_v24  ;;  %v1260_v33 = vadd.f32 1.0, %v1958_v6 }
 0x240   : > { %1971 = vrcp.f32 %v1274_v23  ;;  %v1272_v52 = vadd.f32 1.0, %v1960_v3 }
 0x241   : > { %1973 = vrcp.f32 %v1260_v33 }
 0x242   : > { %1975 = vrcp.f32 %v1272_v52 }
 0x245   : > { %v1962_v18 = vpop.eup %1961 }
 0x246   : > { %v1964_v17 = vpop.eup %1963  ;;  %v1309_v54 = vmul.f32 %v1962_v18, %v3021_v8 }
 0x247   : > { %v1966_v1 = vpop.eup %1965  ;;  %v1321_v10 = vmul.f32 %v1964_v17, %v3024_v60 }
 0x248   : > { %v1968_v49 = vpop.eup %1967  ;;  %v1307_v44 = vmul.f32 %v1966_v1, %v3027_v50 }
 0x249   : > { %v1970_v9 = vpop.eup %1969  ;;  %v1319_v31 = vmul.f32 %v1968_v49, %v3030_v45 }
 0x24a   : > { %v1972_v12 = vpop.eup %1971  ;;  %v1310_v21 = vmul.f32 %v1970_v9, %v1128_v35 }
 0x24b   : > { %v1974_v19 = vpop.eup %1973  ;;  %v1322_v40 = vmul.f32 %v1972_v12, %v3036_v48 }
 0x24c   : > { %v1976_v11 = vpop.eup %1975  ;;  %v1669_v32 = vpack.c.bf16 %v1310_v21, %v1309_v54  ;;  %v1308_v29 = vmul.f32 %v1974_v19, %v3041_v53 }
 0x24d   : > { %v1699_v47 = vpack.c.bf16 %v1322_v40, %v1321_v10  ;;  %v1320_v46 = vmul.f32 %v1976_v11, %v3044_v56 }
 0x24e   : > { %1705 = vst [vmem:[%s2986_s4 + $0x28] sm:$0xff] %v1669_v32   ;;  %v1664_v8 = vpack.c.bf16 %v1308_v29, %v1307_v44 }
 0x24f   : > { %1711 = vst [vmem:[%s2986_s4 + $0x58] sm:$0xff] %v1699_v47   ;;  %v1694_v60 = vpack.c.bf16 %v1320_v46, %v1319_v31 }
 0x250   : > { %1704 = vst [vmem:[%s2986_s4 + $0x20] sm:$0xff] %v1664_v8  }
 0x251   : > { %1710 = vst [vmem:[%s2986_s4 + $0x50] sm:$0xff] %v1694_v60  }
 0x252   : > { %1990 = shalt.err (!%p1987_p6)
}
 0x253   : > { %s1991_s28 = scalar_lea.hbm %s3066_s10, 1536  ;;  %s1995_s6 = scalar_lea.hbm %s3128_s3, 6144 }
 0x254   : > { %p1992_p7 = scmp.ne.s32.totalorder %s3066_s10, %s1991_s28  ;;  %p1996_p11 = scmp.lt.u32.totalorder %s3066_s10, %s3128_s3 }
 0x255   : > { %p1997_p12 = scmp.lt.u32.totalorder %s1995_s6, %s1991_s28  ;;  %p1999_p0 = scmp.lt.u32.totalorder %s1991_s28, %s3066_s10 }
 0x256   : > { %p1993_p9 = pnand %p1992_p7, %p2154_p3 }
 0x257   : > { %p1998_p13 = por %p1997_p12, %p1996_p11 }
 0x258   : > { %p1994_p10 = pneg %p1993_p9 }
 0x259   : > { %p2000_p1 = por %p1999_p0, %p1998_p13 }
 0x25b   : > { %p2001_p2 = pnand %p2000_p1, %p1994_p10 }
 0x25d   : > { %2004 = shalt.err (!%p2001_p2)
}
 0x25e   : > { %s2082_s8 = smov 64  }
 0x25f   : > { %1768 = dma.vmem_to_hbm [thread:$0]  (%p2154_p3), %s3060_s15, 1536, %s3066_s10, %s3072_s11, %s2082_s8, %s2082_s8, %s2075_s27  }
 0x260 PF: > { %p1774_p4 = scmp.ge.s32.totalorder %s2071_s19, 2  ;;  %s1474_s9 = sand.u32 1, %s2043_s12  }
 0x261   : > { %s1475_s20 = scalar_lea.sflag [#allocation3], %s1474_s9 }
 0x262   : > { %p1771_p5 = pnand %p1774_p4, %p2163_p8 }
 0x264   : > { %2038 = dma.done.wait (!%p1771_p5), %s1475_s20, 1536  }
 0x265   : > { %2040 = vsyncadd (!%p1771_p5), %s1475_s20, 4294965760  ;;  %s16_s19 = sadd.s32 1, %s2071_s19   ;;  %s3207_s12 = smov %s2047_s13 }
 0x266   : > { %p13_p6 = scmp.ge.s32.totalorder %s16_s19, 6   ;;  %s3208_s13 = smov %s2051_s14 }
 0x267   : > { %s3209_s14 = smov %s2172_s30  ;;  %s3210_s15 = smov %s2063_s17 }
 0x268   : > { %s3211_s16 = smov %s2067_s18  ;;  %s3212_s17 = smov %s3215_s22 }
 0x269   : > { %s3213_s18 = smov %s3219_s23  ;;  %15 = sbr.rel (!%p13_p6) target bundleno = 5 (0x5), region = 68 }
 0x270   :  { %1480 = vsyncpa [#allocation3], 1 }
 0x271   :  { %1482 = vsyncpa [#allocation3 + $0x1], 1 }

</bundles_post_ra>
